<compile_context>
chip_gen: v5e
topology: v5e:2x2
jax: 0.10.0
libtpu: 0.0.40
codegen_flags: <defaults>
</compile_context>

<pallas_src>
import functools

import jax
import jax.numpy as jnp
from jax.experimental import pallas as pl
from jax.experimental.pallas import tpu as pltpu

LEAKY_SLOPE = 0.01   # torch.nn.LeakyReLU default
BN_EPS = 1e-5        # torch.nn.BatchNorm2d default


def _leaky(v):
    return jnp.where(v >= 0.0, v, LEAKY_SLOPE * v)


def _round_up(x, m):
    return ((x + m - 1) // m) * m


def _pad2(a, rows, cols):
    return jnp.pad(a, ((0, rows - a.shape[0]), (0, cols - a.shape[1])))


def _pick_tile(n_rows, mult, cap):
    """Largest multiple-of-`mult` divisor of n_rows that is <= cap."""
    best = mult
    t = mult
    limit = min(n_rows, cap)
    while t <= limit:
        if n_rows % t == 0:
            best = t
        t += mult
    return best


def _vmem_budget(step_bytes):
    """Generation-aware vmem_limit_bytes: working set + headroom, <= 3/4 of VMEM."""
    try:
        cap = int(pltpu.get_tpu_info().vmem_capacity_bytes)
    except Exception:
        cap = 64 << 20                       # v7x per-TC capacity (most restrictive)
    ceiling = (cap * 3) // 4                 # leave headroom for compiler scratch
    budget = max(step_bytes + (8 << 20), 32 << 20)
    return int(min(budget, ceiling))


# ---------- fused stats pass: phase 0 -> BN1 stats, phase 1 -> per-batch pool stats ----
def _stats_kernel(xcol_ref, w_ref, prm_ref, a1c1_ref, ysum_ref, ysq_ref,
                  s_sc, q_sc, a1_sc, c1_sc, *, inv_n):
    p = pl.program_id(0)
    b = pl.program_id(1)
    t = pl.program_id(2)
    last_b = pl.num_programs(1) - 1
    last_t = pl.num_programs(2) - 1

    acc = jnp.dot(xcol_ref[...], w_ref[...],
                  preferred_element_type=jnp.float32) + prm_ref[0:1, :]

    # global accumulator reset at the start of phase 0, per-batch reset in phase 1
    @pl.when(jnp.logical_or(
        jnp.logical_and(p == 0, jnp.logical_and(b == 0, t == 0)),
        jnp.logical_and(p == 1, t == 0)))
    def _init():
        s_sc[...] = jnp.zeros_like(s_sc)
        q_sc[...] = jnp.zeros_like(q_sc)

    @pl.when(p == 0)
    def _phase0():
        # TODO(synk): E[x^2]-E[x]^2 in one f32 accumulator can cancel for very large N;
        # switch to per-batch partial sums if that regime matters.
        s_sc[...] += jnp.sum(acc, axis=0, keepdims=True)
        q_sc[...] += jnp.sum(acc * acc, axis=0, keepdims=True)

        @pl.when(jnp.logical_and(b == last_b, t == last_t))
        def _fin0():
            mean = s_sc[...] * inv_n
            var = jnp.maximum(q_sc[...] * inv_n - mean * mean, 0.0)
            a1 = prm_ref[1:2, :] * jax.lax.rsqrt(var + BN_EPS)   # gamma1 / std
            c1 = prm_ref[2:3, :] - mean * a1                     # beta1 - mean*gamma1/std
            a1_sc[...] = a1
            c1_sc[...] = c1
            a1c1_ref[0:1, :] = a1
            a1c1_ref[1:2, :] = c1

    @pl.when(p == 1)
    def _phase1():
        y = _leaky(acc * a1_sc[...] + c1_sc[...])
        s_sc[...] += jnp.sum(y, axis=0, keepdims=True)
        q_sc[...] += jnp.sum(y * y, axis=0, keepdims=True)

        @pl.when(t == last_t)
        def _fin1():
            ysum_ref[0] = s_sc[...]
            ysq_ref[0] = q_sc[...]


# ---------- finalize pass: conv + BN1 + act + SE scale + BN2 + act -> packed output ----
def _finalize_kernel(xcol_ref, w_ref, prm_ref, s_ref, out_ref):
    acc = jnp.dot(xcol_ref[...], w_ref[...],
                  preferred_element_type=jnp.float32) + prm_ref[0:1, :]
    y = _leaky(acc * prm_ref[1:2, :] + prm_ref[2:3, :])
    z = y * s_ref[0]                                             # per-batch gate broadcast
    out_ref[...] = _leaky(z * prm_ref[3:4, :] + prm_ref[4:5, :]).astype(out_ref.dtype)


def conv2d_batchnorm_forward(x_nchw, params, kernel_size=(3, 3)):
    B, Cin, H, W = x_nchw.shape
    kh, kw = kernel_size
    Cout = params["conv_w"].shape[0]
    HW = H * W
    N = B * HW
    KKC = kh * kw * Cin
    Cp = _round_up(Cout, 128)
    f32 = jnp.float32

    assert HW % 8 == 0, "H*W must be a multiple of 8"

    # --- layout glue: NCHW -> NHWC, 'same' padding, im2col (bf16 MXU operands) ---
    x = jnp.transpose(x_nchw, (0, 2, 3, 1)).astype(f32)
    ph, pw = kh - 1, kw - 1
    xp = jnp.pad(x, ((0, 0), (ph // 2, ph - ph // 2), (pw // 2, pw - pw // 2), (0, 0)))
    cols = [xp[:, i:i + H, j:j + W, :].reshape(N, Cin)
            for i in range(kh) for j in range(kw)]
    xcol = jnp.concatenate(cols, axis=-1).astype(jnp.bfloat16)               # (N, KKC)
    # TODO(synk): for large Cin (KKC >> 2*Cp) move im2col in-kernel (shifted matmuls)
    # or store the conv acc once instead of recomputing it per pass.

    # conv weight (Cout, Cin, kh, kw) -> (KKC, Cout)
    w_flat = jnp.transpose(params["conv_w"], (2, 3, 1, 0)).reshape(KKC, Cout).astype(f32)
    w_pad = _pad2(w_flat, KKC, Cp).astype(jnp.bfloat16)

    pad_row = lambda v: _pad2(v.reshape(1, -1).astype(f32), 1, Cp)
    cb = pad_row(params["conv_b"])
    g1 = pad_row(params["bn1_gamma"])
    b1 = pad_row(params["bn1_beta"])

    xcol_bytes = N * KKC * 2
    conv_flops = 2 * N * KKC * Cp

    # ------------------ fused stats pass (grid: phase x batch x spatial tiles) ---------
    mult_s = 16 if HW % 16 == 0 else 8
    tile_m = _pick_tile(HW, mult_s, cap=2048)
    T = HW // tile_m
    grid_s = (2, B, T)

    x_spec = pl.BlockSpec((tile_m, KKC), lambda p, b, t: (b * T + t, 0))
    w_spec = pl.BlockSpec((KKC, Cp), lambda p, b, t: (0, 0))
    prm_spec = pl.BlockSpec((3, Cp), lambda p, b, t: (0, 0))
    a1c1_spec = pl.BlockSpec((2, Cp), lambda p, b, t: (0, 0))
    pb_spec = pl.BlockSpec((1, 1, Cp), lambda p, b, t: (b, 0, 0))

    step_bytes_s = 2 * (tile_m * KKC * 2) + KKC * Cp * 2 + (3 + 2 + 4) * Cp * 4 \
        + 2 * B * Cp * 4

    prm_s = jnp.concatenate([cb, g1, b1], axis=0)                            # (3, Cp)
    a1c1, ysum, ysq = pl.pallas_call(
        functools.partial(_stats_kernel, inv_n=1.0 / N),
        grid=grid_s,
        in_specs=[x_spec, w_spec, prm_spec],
        out_specs=(a1c1_spec, pb_spec, pb_spec),
        out_shape=(jax.ShapeDtypeStruct((2, Cp), f32),
                   jax.ShapeDtypeStruct((B, 1, Cp), f32),
                   jax.ShapeDtypeStruct((B, 1, Cp), f32)),
        scratch_shapes=[pltpu.VMEM((1, Cp), f32)] * 4,
        compiler_params=pltpu.CompilerParams(
            dimension_semantics=("arbitrary", "arbitrary", "arbitrary"),
            vmem_limit_bytes=_vmem_budget(step_bytes_s)),
        cost_estimate=pl.CostEstimate(
            flops=2 * conv_flops + 10 * N * Cp, transcendentals=0,
            bytes_accessed=2 * xcol_bytes + KKC * Cp * 2 + (2 * B + 5) * Cp * 4),
    )(xcol, w_pad, prm_s)

    # ------------- SE head + analytical BN2 statistics (tiny; plain JAX glue) ----------
    a1 = a1c1[0, :Cout]
    c1 = a1c1[1, :Cout]
    ysum_c = ysum[:, 0, :Cout]                                               # (B, Cout)
    ysq_c = ysq[:, 0, :Cout]
    pooled = ysum_c / HW
    # NOTE: fc1_w / fc2_w are consumed in math (in, out) layout; a real torch nn.Linear
    # stores (out, in), so transpose when importing actual module weights.
    h = _leaky(pooled @ params["fc1_w"].astype(f32) + params["fc1_b"].astype(f32))
    s = jax.nn.sigmoid(h @ params["fc2_w"].astype(f32) + params["fc2_b"].astype(f32))
    # BN2 runs on z = y * s_b; its batch statistics follow from the per-batch y sums:
    m2 = jnp.sum(s * ysum_c, axis=0) / N
    e2 = jnp.sum(s * s * ysq_c, axis=0) / N
    var2 = jnp.maximum(e2 - m2 * m2, 0.0)
    a2 = params["bn2_gamma"].astype(f32) * jax.lax.rsqrt(var2 + BN_EPS)
    c2 = params["bn2_beta"].astype(f32) - m2 * a2

    # --------------------- finalize pass: lane-dense / lane-packed output --------------
    packed = (Cout < 128) and (128 % Cout == 0)
    g = 128 // Cout if packed else 1
    if packed and (HW % g != 0 or (HW // g) % 8 != 0):
        packed = False
        g = 1

    if packed:
        # Pack g spatial rows per output row: all 128 lanes are real data, removing the
        # Cp-padding write amplification and the post-kernel crop.  The conv weight
        # becomes block-diagonal over the g packed positions (same MXU flop count).
        KKCg, Cpk = g * KKC, g * Cout                                        # Cpk == 128
        xcol_d = xcol.reshape(N // g, KKCg)                                  # free reshape
        w_d = jnp.kron(jnp.eye(g, dtype=f32), w_flat).astype(jnp.bfloat16)
        lane = lambda v: jnp.tile(v.reshape(1, Cout).astype(f32), (1, g))
        s_lane = jnp.tile(s.astype(f32), (1, g)).reshape(B, 1, Cpk)
        rows_d = HW // g
        out_dtype = f32                                                      # exact-size writes
    else:
        KKCg, Cpk = KKC, Cp
        xcol_d = xcol
        w_d = w_pad
        lane = lambda v: _pad2(v.reshape(1, Cout).astype(f32), 1, Cp)
        s_lane = _pad2(s.astype(f32), B, Cp).reshape(B, 1, Cp)
        rows_d = HW
        out_dtype = jnp.bfloat16                                             # halve padded writes

    mult_d = 16 if rows_d % 16 == 0 else 8
    tile_p = _pick_tile(rows_d, mult_d, cap=1024)
    if (not packed) and tile_p % 16 != 0:
        out_dtype = f32                                                      # keep tiling safe
    Tp = rows_d // tile_p
    grid_d = (B, Tp)
    out_rows = B * rows_d
    out_isz = jnp.dtype(out_dtype).itemsize

    prm_d = jnp.concatenate(
        [lane(params["conv_b"].astype(f32)), lane(a1), lane(c1), lane(a2), lane(c2)],
        axis=0)                                                              # (5, Cpk)

    xd_spec = pl.BlockSpec((tile_p, KKCg), lambda b, t: (b * Tp + t, 0))
    wd_spec = pl.BlockSpec((KKCg, Cpk), lambda b, t: (0, 0))
    pd_spec = pl.BlockSpec((5, Cpk), lambda b, t: (0, 0))
    sd_spec = pl.BlockSpec((1, 1, Cpk), lambda b, t: (b, 0, 0))
    od_spec = pl.BlockSpec((tile_p, Cpk), lambda b, t: (b * Tp + t, 0))

    step_bytes_d = 2 * (tile_p * KKCg * 2 + tile_p * Cpk * out_isz) \
        + KKCg * Cpk * 2 + 6 * Cpk * 4

    out_flat = pl.pallas_call(
        _finalize_kernel,
        grid=grid_d,
        in_specs=[xd_spec, wd_spec, pd_spec, sd_spec],
        out_specs=od_spec,
        out_shape=jax.ShapeDtypeStruct((out_rows, Cpk), out_dtype),
        compiler_params=pltpu.CompilerParams(
            dimension_semantics=("parallel", "parallel"),
            vmem_limit_bytes=_vmem_budget(step_bytes_d)),
        cost_estimate=pl.CostEstimate(
            flops=2 * out_rows * KKCg * Cpk + 9 * out_rows * Cpk, transcendentals=0,
            bytes_accessed=xcol_bytes + KKCg * Cpk * 2 + out_rows * Cpk * out_isz),
    )(xcol_d, w_d, prm_d, s_lane)

    if packed:
        out_nhwc = out_flat.reshape(B, H, W, Cout)        # pure (free) reshapes
    else:
        out_nhwc = out_flat[:, :Cout].astype(f32).reshape(B, H, W, Cout)
    # TODO(synk): the NCHW transpose is one extra exact-size HBM pass; keep NHWC if the
    # consumer allows it.
    return jnp.transpose(out_nhwc, (0, 3, 1, 2))


def reference_forward(x_nchw, params):
    """Pure-JAX f32 reference mirroring the PyTorch forward (training-mode BN)."""
    y = jax.lax.conv_general_dilated(
        x_nchw, params["conv_w"], window_strides=(1, 1), padding="SAME",
        dimension_numbers=("NCHW", "OIHW", "NCHW"))
    y = y + params["conv_b"][None, :, None, None]

    def bn(t, g, b):
        m = jnp.mean(t, axis=(0, 2, 3), keepdims=True)
        v = jnp.mean((t - m) ** 2, axis=(0, 2, 3), keepdims=True)
        return (t - m) / jnp.sqrt(v + BN_EPS) * g[None, :, None, None] + b[None, :, None, None]

    leaky = lambda t: jnp.where(t >= 0, t, LEAKY_SLOPE * t)

    y = leaky(bn(y, params["bn1_gamma"], params["bn1_beta"]))
    pooled = jnp.mean(y, axis=(2, 3))                                        # (B, C)
    h = leaky(pooled @ params["fc1_w"] + params["fc1_b"])
    s = jax.nn.sigmoid(h @ params["fc2_w"] + params["fc2_b"])
    z = y * s[:, :, None, None]
    return leaky(bn(z, params["bn2_gamma"], params["bn2_beta"]))


if __name__ == "__main__":
    B, Cin, H, W = 2, 4, 16, 16
    Cout, k = 16, 3
    Cr = Cout // 8   # reduction_ratio = 8

    keys = jax.random.split(jax.random.PRNGKey(0), 8)
    params = {
        "conv_w": 0.1 * jax.random.normal(keys[0], (Cout, Cin, k, k), jnp.float32),
        "conv_b": 0.1 * jax.random.normal(keys[1], (Cout,), jnp.float32),
        "bn1_gamma": jnp.ones((Cout,), jnp.float32),
        "bn1_beta": jnp.zeros((Cout,), jnp.float32),
        "fc1_w": 0.1 * jax.random.normal(keys[2], (Cout, Cr), jnp.float32),  # math (in, out)
        "fc1_b": 0.1 * jax.random.normal(keys[3], (Cr,), jnp.float32),
        "fc2_w": 0.1 * jax.random.normal(keys[4], (Cr, Cout), jnp.float32),
        "fc2_b": 0.1 * jax.random.normal(keys[5], (Cout,), jnp.float32),
        "bn2_gamma": jnp.ones((Cout,), jnp.float32),
        "bn2_beta": jnp.zeros((Cout,), jnp.float32),
    }
    x = jax.random.normal(keys[6], (B, Cin, H, W), jnp.float32)

    fwd = jax.jit(lambda xx, pp: conv2d_batchnorm_forward(xx, pp, (k, k)))
    out = jax.block_until_ready(fwd(x, params))

    ref = reference_forward(x, params)
    assert out.shape == (B, Cout, H, W)
    assert bool(jnp.all(jnp.isfinite(out)))
    # bf16 MXU operands vs the f32 reference -> slightly looser tolerance than pure f32
    if not jnp.allclose(out, ref, rtol=3e-2, atol=3e-2):
        err = float(jnp.max(jnp.abs(out - ref)))
        raise AssertionError(
            f"Pallas kernel output does not match JAX reference (max abs err {err:.4f})")
    print("KERNEL_OK")
</pallas_src>

<mosaic_0001>
module attributes {stable_mosaic.version = 11 : i64} {
  func.func @_stats_kernel(%arg0: i32, %arg1: i32, %arg2: i32, %arg3: memref<256x36xbf16, #tpu.memory_space<vmem>>, %arg4: memref<36x128xbf16, #tpu.memory_space<vmem>>, %arg5: memref<3x128xf32, #tpu.memory_space<vmem>>, %arg6: memref<2x128xf32, #tpu.memory_space<vmem>>, %arg7: memref<1x1x128xf32, #tpu.memory_space<vmem>>, %arg8: memref<1x1x128xf32, #tpu.memory_space<vmem>>, %arg9: memref<1x128xf32, #tpu.memory_space<vmem>>, %arg10: memref<1x128xf32, #tpu.memory_space<vmem>>, %arg11: memref<1x128xf32, #tpu.memory_space<vmem>>, %arg12: memref<1x128xf32, #tpu.memory_space<vmem>>) attributes {dimension_semantics = [#tpu.dimension_semantics<arbitrary>, #tpu.dimension_semantics<arbitrary>, #tpu.dimension_semantics<arbitrary>], iteration_bounds = array<i64: 2, 2, 1>, scalar_prefetch = 0 : i64, scratch_operands = 4 : i64, tpu.core_type = #tpu.core_type<tc>, window_params = [{transform_indices = @transform_0, window_bounds = array<i64: 256, 36>}, {pipeline_mode = #tpu.pipeline_mode<synchronous>, transform_indices = @transform_1, window_bounds = array<i64: 36, 128>}, {pipeline_mode = #tpu.pipeline_mode<synchronous>, transform_indices = @transform_2, window_bounds = array<i64: 3, 128>}, {pipeline_mode = #tpu.pipeline_mode<synchronous>, transform_indices = @transform_3, window_bounds = array<i64: 2, 128>}, {transform_indices = @transform_4, window_bounds = array<i64: 1, 1, 128>}, {transform_indices = @transform_5, window_bounds = array<i64: 1, 1, 128>}]} {
    %c0 = arith.constant 0 : index
    %c0_0 = arith.constant 0 : index
    %0 = vector.load %arg3[%c0, %c0_0] : memref<256x36xbf16, #tpu.memory_space<vmem>>, vector<256x36xbf16>
    %c0_1 = arith.constant 0 : index
    %c0_2 = arith.constant 0 : index
    %1 = vector.load %arg4[%c0_1, %c0_2] : memref<36x128xbf16, #tpu.memory_space<vmem>>, vector<36x128xbf16>
    %cst = arith.constant dense<0.000000e+00> : vector<256x128xf32>
    %2 = tpu.matmul %0, %1, %cst {dimension_numbers = #tpu.dot_dimension_numbers<[1], [0], [0], [1], [0, 0, 1, 1], [], []>} : vector<256x36xbf16>, vector<36x128xbf16>, vector<256x128xf32> -> vector<256x128xf32>
    %c0_3 = arith.constant 0 : index
    %c0_4 = arith.constant 0 : index
    %3 = vector.load %arg5[%c0_3, %c0_4] : memref<3x128xf32, #tpu.memory_space<vmem>>, vector<1x128xf32>
    %4 = vector.broadcast %3 : vector<1x128xf32> to vector<256x128xf32>
    %5 = arith.addf %2, %4 : vector<256x128xf32>
    %c0_i32 = arith.constant 0 : i32
    %6 = arith.cmpi eq, %arg0, %c0_i32 : i32
    %c0_i32_5 = arith.constant 0 : i32
    %7 = arith.cmpi eq, %arg1, %c0_i32_5 : i32
    %c0_i32_6 = arith.constant 0 : i32
    %8 = arith.cmpi eq, %arg2, %c0_i32_6 : i32
    %9 = arith.andi %7, %8 : i1
    %10 = arith.andi %6, %9 : i1
    %c1_i32 = arith.constant 1 : i32
    %11 = arith.cmpi eq, %arg0, %c1_i32 : i32
    %c0_i32_7 = arith.constant 0 : i32
    %12 = arith.cmpi eq, %arg2, %c0_i32_7 : i32
    %13 = arith.andi %11, %12 : i1
    %14 = arith.ori %10, %13 : i1
    %15 = arith.extui %14 : i1 to i32
    %c0_i32_8 = arith.constant 0 : i32
    %16 = arith.cmpi ne, %15, %c0_i32_8 : i32
    scf.if %16 {
      %cst_13 = arith.constant 0.000000e+00 : f32
      %23 = vector.broadcast %cst_13 : f32 to vector<1x128xf32>
      %c0_14 = arith.constant 0 : index
      %c0_15 = arith.constant 0 : index
      %24 = vector.load %arg9[%c0_14, %c0_15] : memref<1x128xf32, #tpu.memory_space<vmem>>, vector<1x128xf32>
      tpu.vector_store %arg9[%c0_14, %c0_15], %23 {strides = array<i32>} : memref<1x128xf32, #tpu.memory_space<vmem>>, vector<1x128xf32>,
      %cst_16 = arith.constant 0.000000e+00 : f32
      %25 = vector.broadcast %cst_16 : f32 to vector<1x128xf32>
      %c0_17 = arith.constant 0 : index
      %c0_18 = arith.constant 0 : index
      %26 = vector.load %arg10[%c0_17, %c0_18] : memref<1x128xf32, #tpu.memory_space<vmem>>, vector<1x128xf32>
      tpu.vector_store %arg10[%c0_17, %c0_18], %25 {strides = array<i32>} : memref<1x128xf32, #tpu.memory_space<vmem>>, vector<1x128xf32>,
    } else {
    }
    %c0_i32_9 = arith.constant 0 : i32
    %17 = arith.cmpi eq, %arg0, %c0_i32_9 : i32
    %18 = arith.extui %17 : i1 to i32
    %c0_i32_10 = arith.constant 0 : i32
    %19 = arith.cmpi ne, %18, %c0_i32_10 : i32
    scf.if %19 {
      %c0_13 = arith.constant 0 : index
      %c0_14 = arith.constant 0 : index
      %23 = vector.load %arg9[%c0_13, %c0_14] : memref<1x128xf32, #tpu.memory_space<vmem>>, vector<1x128xf32>
      %cst_15 = arith.constant dense<0.000000e+00> : vector<128xf32>
      %24 = vector.multi_reduction <add>, %5, %cst_15 [0] : vector<256x128xf32> to vector<128xf32>
      %25 = vector.shape_cast %24 : vector<128xf32> to vector<1x128xf32>
      %26 = arith.addf %23, %25 : vector<1x128xf32>
      %c0_16 = arith.constant 0 : index
      %c0_17 = arith.constant 0 : index
      %27 = vector.load %arg9[%c0_16, %c0_17] : memref<1x128xf32, #tpu.memory_space<vmem>>, vector<1x128xf32>
      tpu.vector_store %arg9[%c0_16, %c0_17], %26 {strides = array<i32>} : memref<1x128xf32, #tpu.memory_space<vmem>>, vector<1x128xf32>,
      %c0_18 = arith.constant 0 : index
      %c0_19 = arith.constant 0 : index
      %28 = vector.load %arg10[%c0_18, %c0_19] : memref<1x128xf32, #tpu.memory_space<vmem>>, vector<1x128xf32>
      %29 = arith.mulf %5, %5 : vector<256x128xf32>
      %cst_20 = arith.constant dense<0.000000e+00> : vector<128xf32>
      %30 = vector.multi_reduction <add>, %29, %cst_20 [0] : vector<256x128xf32> to vector<128xf32>
      %31 = vector.shape_cast %30 : vector<128xf32> to vector<1x128xf32>
      %32 = arith.addf %28, %31 : vector<1x128xf32>
      %c0_21 = arith.constant 0 : index
      %c0_22 = arith.constant 0 : index
      %33 = vector.load %arg10[%c0_21, %c0_22] : memref<1x128xf32, #tpu.memory_space<vmem>>, vector<1x128xf32>
      tpu.vector_store %arg10[%c0_21, %c0_22], %32 {strides = array<i32>} : memref<1x128xf32, #tpu.memory_space<vmem>>, vector<1x128xf32>,
      %c1_i32_23 = arith.constant 1 : i32
      %34 = arith.cmpi eq, %arg1, %c1_i32_23 : i32
      %c0_i32_24 = arith.constant 0 : i32
      %35 = arith.cmpi eq, %arg2, %c0_i32_24 : i32
      %36 = arith.andi %34, %35 : i1
      %37 = arith.extui %36 : i1 to i32
      %c0_i32_25 = arith.constant 0 : i32
      %38 = arith.cmpi ne, %37, %c0_i32_25 : i32
      scf.if %38 {
        %c0_26 = arith.constant 0 : index
        %c0_27 = arith.constant 0 : index
        %39 = vector.load %arg9[%c0_26, %c0_27] : memref<1x128xf32, #tpu.memory_space<vmem>>, vector<1x128xf32>
        %cst_28 = arith.constant 0.001953125 : f32
        %40 = vector.broadcast %cst_28 : f32 to vector<1x128xf32>
        %41 = arith.mulf %39, %40 : vector<1x128xf32>
        %c0_29 = arith.constant 0 : index
        %c0_30 = arith.constant 0 : index
        %42 = vector.load %arg10[%c0_29, %c0_30] : memref<1x128xf32, #tpu.memory_space<vmem>>, vector<1x128xf32>
        %cst_31 = arith.constant 0.001953125 : f32
        %43 = vector.broadcast %cst_31 : f32 to vector<1x128xf32>
        %44 = arith.mulf %42, %43 : vector<1x128xf32>
        %45 = arith.mulf %41, %41 : vector<1x128xf32>
        %46 = arith.subf %44, %45 : vector<1x128xf32>
        %cst_32 = arith.constant 0.000000e+00 : f32
        %47 = vector.broadcast %cst_32 : f32 to vector<1x128xf32>
        %48 = arith.maximumf %46, %47 : vector<1x128xf32>
        %c1 = arith.constant 1 : index
        %c0_33 = arith.constant 0 : index
        %49 = vector.load %arg5[%c1, %c0_33] : memref<3x128xf32, #tpu.memory_space<vmem>>, vector<1x128xf32>
        %cst_34 = arith.constant 9.99999974E-6 : f32
        %50 = vector.broadcast %cst_34 : f32 to vector<1x128xf32>
        %51 = arith.addf %48, %50 : vector<1x128xf32>
        %52 = math.rsqrt %51 : vector<1x128xf32>
        %53 = arith.mulf %49, %52 : vector<1x128xf32>
        %c2 = arith.constant 2 : index
        %c0_35 = arith.constant 0 : index
        %54 = vector.load %arg5[%c2, %c0_35] : memref<3x128xf32, #tpu.memory_space<vmem>>, vector<1x128xf32>
        %55 = arith.mulf %41, %53 : vector<1x128xf32>
        %56 = arith.subf %54, %55 : vector<1x128xf32>
        %c0_36 = arith.constant 0 : index
        %c0_37 = arith.constant 0 : index
        %57 = vector.load %arg11[%c0_36, %c0_37] : memref<1x128xf32, #tpu.memory_space<vmem>>, vector<1x128xf32>
        tpu.vector_store %arg11[%c0_36, %c0_37], %53 {strides = array<i32>} : memref<1x128xf32, #tpu.memory_space<vmem>>, vector<1x128xf32>,
        %c0_38 = arith.constant 0 : index
        %c0_39 = arith.constant 0 : index
        %58 = vector.load %arg12[%c0_38, %c0_39] : memref<1x128xf32, #tpu.memory_space<vmem>>, vector<1x128xf32>
        tpu.vector_store %arg12[%c0_38, %c0_39], %56 {strides = array<i32>} : memref<1x128xf32, #tpu.memory_space<vmem>>, vector<1x128xf32>,
        %c0_40 = arith.constant 0 : index
        %c0_41 = arith.constant 0 : index
        %59 = vector.load %arg6[%c0_40, %c0_41] : memref<2x128xf32, #tpu.memory_space<vmem>>, vector<1x128xf32>
        tpu.vector_store %arg6[%c0_40, %c0_41], %53 {strides = array<i32>} : memref<2x128xf32, #tpu.memory_space<vmem>>, vector<1x128xf32>,
        %c1_42 = arith.constant 1 : index
        %c0_43 = arith.constant 0 : index
        %60 = vector.load %arg6[%c1_42, %c0_43] : memref<2x128xf32, #tpu.memory_space<vmem>>, vector<1x128xf32>
        tpu.vector_store %arg6[%c1_42, %c0_43], %56 {strides = array<i32>} : memref<2x128xf32, #tpu.memory_space<vmem>>, vector<1x128xf32>,
      } else {
      }
    } else {
    }
    %c1_i32_11 = arith.constant 1 : i32
    %20 = arith.cmpi eq, %arg0, %c1_i32_11 : i32
    %21 = arith.extui %20 : i1 to i32
    %c0_i32_12 = arith.constant 0 : i32
    %22 = arith.cmpi ne, %21, %c0_i32_12 : i32
    scf.if %22 {
      %c0_13 = arith.constant 0 : index
      %c0_14 = arith.constant 0 : index
      %23 = vector.load %arg11[%c0_13, %c0_14] : memref<1x128xf32, #tpu.memory_space<vmem>>, vector<1x128xf32>
      %24 = vector.broadcast %23 : vector<1x128xf32> to vector<256x128xf32>
      %25 = arith.mulf %5, %24 : vector<256x128xf32>
      %c0_15 = arith.constant 0 : index
      %c0_16 = arith.constant 0 : index
      %26 = vector.load %arg12[%c0_15, %c0_16] : memref<1x128xf32, #tpu.memory_space<vmem>>, vector<1x128xf32>
      %27 = vector.broadcast %26 : vector<1x128xf32> to vector<256x128xf32>
      %28 = arith.addf %25, %27 : vector<256x128xf32>
      %cst_17 = arith.constant 0.000000e+00 : f32
      %29 = vector.broadcast %cst_17 : f32 to vector<256x128xf32>
      %30 = arith.cmpf oge, %28, %29 : vector<256x128xf32>
      %cst_18 = arith.constant 0.00999999977 : f32
      %31 = vector.broadcast %cst_18 : f32 to vector<256x128xf32>
      %32 = arith.mulf %31, %28 : vector<256x128xf32>
      %33 = arith.select %30, %28, %32 : vector<256x128xi1>, vector<256x128xf32>
      %c0_19 = arith.constant 0 : index
      %c0_20 = arith.constant 0 : index
      %34 = vector.load %arg9[%c0_19, %c0_20] : memref<1x128xf32, #tpu.memory_space<vmem>>, vector<1x128xf32>
      %cst_21 = arith.constant dense<0.000000e+00> : vector<128xf32>
      %35 = vector.multi_reduction <add>, %33, %cst_21 [0] : vector<256x128xf32> to vector<128xf32>
      %36 = vector.shape_cast %35 : vector<128xf32> to vector<1x128xf32>
      %37 = arith.addf %34, %36 : vector<1x128xf32>
      %c0_22 = arith.constant 0 : index
      %c0_23 = arith.constant 0 : index
      %38 = vector.load %arg9[%c0_22, %c0_23] : memref<1x128xf32, #tpu.memory_space<vmem>>, vector<1x128xf32>
      tpu.vector_store %arg9[%c0_22, %c0_23], %37 {strides = array<i32>} : memref<1x128xf32, #tpu.memory_space<vmem>>, vector<1x128xf32>,
      %c0_24 = arith.constant 0 : index
      %c0_25 = arith.constant 0 : index
      %39 = vector.load %arg10[%c0_24, %c0_25] : memref<1x128xf32, #tpu.memory_space<vmem>>, vector<1x128xf32>
      %40 = arith.mulf %33, %33 : vector<256x128xf32>
      %cst_26 = arith.constant dense<0.000000e+00> : vector<128xf32>
      %41 = vector.multi_reduction <add>, %40, %cst_26 [0] : vector<256x128xf32> to vector<128xf32>
      %42 = vector.shape_cast %41 : vector<128xf32> to vector<1x128xf32>
      %43 = arith.addf %39, %42 : vector<1x128xf32>
      %c0_27 = arith.constant 0 : index
      %c0_28 = arith.constant 0 : index
      %44 = vector.load %arg10[%c0_27, %c0_28] : memref<1x128xf32, #tpu.memory_space<vmem>>, vector<1x128xf32>
      tpu.vector_store %arg10[%c0_27, %c0_28], %43 {strides = array<i32>} : memref<1x128xf32, #tpu.memory_space<vmem>>, vector<1x128xf32>,
      %c0_i32_29 = arith.constant 0 : i32
      %45 = arith.cmpi eq, %arg2, %c0_i32_29 : i32
      %46 = arith.extui %45 : i1 to i32
      %c0_i32_30 = arith.constant 0 : i32
      %47 = arith.cmpi ne, %46, %c0_i32_30 : i32
      scf.if %47 {
        %c0_31 = arith.constant 0 : index
        %c0_32 = arith.constant 0 : index
        %48 = vector.load %arg9[%c0_31, %c0_32] : memref<1x128xf32, #tpu.memory_space<vmem>>, vector<1x128xf32>
        %c0_33 = arith.constant 0 : index
        %c0_34 = arith.constant 0 : index
        %c0_35 = arith.constant 0 : index
        %49 = vector.load %arg7[%c0_33, %c0_34, %c0_35] : memref<1x1x128xf32, #tpu.memory_space<vmem>>, vector<1x1x128xf32>
        %50 = vector.shape_cast %49 : vector<1x1x128xf32> to vector<1x128xf32>
        %51 = vector.shape_cast %48 : vector<1x128xf32> to vector<1x1x128xf32>
        tpu.vector_store %arg7[%c0_33, %c0_34, %c0_35], %51 {strides = array<i32>} : memref<1x1x128xf32, #tpu.memory_space<vmem>>, vector<1x1x128xf32>,
        %c0_36 = arith.constant 0 : index
        %c0_37 = arith.constant 0 : index
        %52 = vector.load %arg10[%c0_36, %c0_37] : memref<1x128xf32, #tpu.memory_space<vmem>>, vector<1x128xf32>
        %c0_38 = arith.constant 0 : index
        %c0_39 = arith.constant 0 : index
        %c0_40 = arith.constant 0 : index
        %53 = vector.load %arg8[%c0_38, %c0_39, %c0_40] : memref<1x1x128xf32, #tpu.memory_space<vmem>>, vector<1x1x128xf32>
        %54 = vector.shape_cast %53 : vector<1x1x128xf32> to vector<1x128xf32>
        %55 = vector.shape_cast %52 : vector<1x128xf32> to vector<1x1x128xf32>
        tpu.vector_store %arg8[%c0_38, %c0_39, %c0_40], %55 {strides = array<i32>} : memref<1x1x128xf32, #tpu.memory_space<vmem>>, vector<1x1x128xf32>,
      } else {
      }
    } else {
    }
    return
  }
  func.func @transform_0(%arg0: i32, %arg1: i32, %arg2: i32) -> (i32, i32) {
    %c1_i32 = arith.constant 1 : i32
    %0 = arith.muli %arg1, %c1_i32 : i32
    %1 = arith.addi %0, %arg2 : i32
    %c0_i32 = arith.constant 0 : i32
    %c0_i32_0 = arith.constant 0 : i32
    return %1, %c0_i32 : i32, i32
  }
  func.func @transform_1(%arg0: i32, %arg1: i32, %arg2: i32) -> (i32, i32) {
    %c0_i32 = arith.constant 0 : i32
    %c0_i32_0 = arith.constant 0 : i32
    %c0_i32_1 = arith.constant 0 : i32
    return %c0_i32, %c0_i32_0 : i32, i32
  }
  func.func @transform_2(%arg0: i32, %arg1: i32, %arg2: i32) -> (i32, i32) {
    %c0_i32 = arith.constant 0 : i32
    %c0_i32_0 = arith.constant 0 : i32
    %c0_i32_1 = arith.constant 0 : i32
    return %c0_i32, %c0_i32_0 : i32, i32
  }
  func.func @transform_3(%arg0: i32, %arg1: i32, %arg2: i32) -> (i32, i32) {
    %c0_i32 = arith.constant 0 : i32
    %c0_i32_0 = arith.constant 0 : i32
    %c0_i32_1 = arith.constant 0 : i32
    return %c0_i32, %c0_i32_0 : i32, i32
  }
  func.func @transform_4(%arg0: i32, %arg1: i32, %arg2: i32) -> (i32, i32, i32) {
    %c0_i32 = arith.constant 0 : i32
    %c0_i32_0 = arith.constant 0 : i32
    %c0_i32_1 = arith.constant 0 : i32
    return %arg1, %c0_i32, %c0_i32_0 : i32, i32, i32
  }
  func.func @transform_5(%arg0: i32, %arg1: i32, %arg2: i32) -> (i32, i32, i32) {
    %c0_i32 = arith.constant 0 : i32
    %c0_i32_0 = arith.constant 0 : i32
    %c0_i32_1 = arith.constant 0 : i32
    return %arg1, %c0_i32, %c0_i32_0 : i32, i32, i32
  }
}

module attributes {stable_mosaic.version = 11 : i64} {
  func.func @_finalize_kernel(%arg0: i32, %arg1: i32, %arg2: memref<32x288xbf16, #tpu.memory_space<vmem>>, %arg3: memref<288x128xbf16, #tpu.memory_space<vmem>>, %arg4: memref<5x128xf32, #tpu.memory_space<vmem>>, %arg5: memref<1x1x128xf32, #tpu.memory_space<vmem>>, %arg6: memref<32x128xf32, #tpu.memory_space<vmem>>) attributes {dimension_semantics = [#tpu.dimension_semantics<parallel>, #tpu.dimension_semantics<parallel>], iteration_bounds = array<i64: 2, 1>, scalar_prefetch = 0 : i64, scratch_operands = 0 : i64, tpu.core_type = #tpu.core_type<tc>, window_params = [{transform_indices = @transform_0, window_bounds = array<i64: 32, 288>}, {pipeline_mode = #tpu.pipeline_mode<synchronous>, transform_indices = @transform_1, window_bounds = array<i64: 288, 128>}, {pipeline_mode = #tpu.pipeline_mode<synchronous>, transform_indices = @transform_2, window_bounds = array<i64: 5, 128>}, {transform_indices = @transform_3, window_bounds = array<i64: 1, 1, 128>}, {transform_indices = @transform_4, window_bounds = array<i64: 32, 128>}]} {
    %c0 = arith.constant 0 : index
    %c0_0 = arith.constant 0 : index
    %0 = vector.load %arg2[%c0, %c0_0] : memref<32x288xbf16, #tpu.memory_space<vmem>>, vector<32x288xbf16>
    %c0_1 = arith.constant 0 : index
    %c0_2 = arith.constant 0 : index
    %1 = vector.load %arg3[%c0_1, %c0_2] : memref<288x128xbf16, #tpu.memory_space<vmem>>, vector<288x128xbf16>
    %cst = arith.constant dense<0.000000e+00> : vector<32x128xf32>
    %2 = tpu.matmul %0, %1, %cst {dimension_numbers = #tpu.dot_dimension_numbers<[1], [0], [0], [1], [0, 0, 1, 1], [], []>} : vector<32x288xbf16>, vector<288x128xbf16>, vector<32x128xf32> -> vector<32x128xf32>
    %c0_3 = arith.constant 0 : index
    %c0_4 = arith.constant 0 : index
    %3 = vector.load %arg4[%c0_3, %c0_4] : memref<5x128xf32, #tpu.memory_space<vmem>>, vector<1x128xf32>
    %4 = vector.broadcast %3 : vector<1x128xf32> to vector<32x128xf32>
    %5 = arith.addf %2, %4 : vector<32x128xf32>
    %c1 = arith.constant 1 : index
    %c0_5 = arith.constant 0 : index
    %6 = vector.load %arg4[%c1, %c0_5] : memref<5x128xf32, #tpu.memory_space<vmem>>, vector<1x128xf32>
    %7 = vector.broadcast %6 : vector<1x128xf32> to vector<32x128xf32>
    %8 = arith.mulf %5, %7 : vector<32x128xf32>
    %c2 = arith.constant 2 : index
    %c0_6 = arith.constant 0 : index
    %9 = vector.load %arg4[%c2, %c0_6] : memref<5x128xf32, #tpu.memory_space<vmem>>, vector<1x128xf32>
    %10 = vector.broadcast %9 : vector<1x128xf32> to vector<32x128xf32>
    %11 = arith.addf %8, %10 : vector<32x128xf32>
    %cst_7 = arith.constant 0.000000e+00 : f32
    %12 = vector.broadcast %cst_7 : f32 to vector<32x128xf32>
    %13 = arith.cmpf oge, %11, %12 : vector<32x128xf32>
    %cst_8 = arith.constant 0.00999999977 : f32
    %14 = vector.broadcast %cst_8 : f32 to vector<32x128xf32>
    %15 = arith.mulf %14, %11 : vector<32x128xf32>
    %16 = arith.select %13, %11, %15 : vector<32x128xi1>, vector<32x128xf32>
    %c0_9 = arith.constant 0 : index
    %c0_10 = arith.constant 0 : index
    %c0_11 = arith.constant 0 : index
    %17 = vector.load %arg5[%c0_9, %c0_10, %c0_11] : memref<1x1x128xf32, #tpu.memory_space<vmem>>, vector<1x1x128xf32>
    %18 = vector.shape_cast %17 : vector<1x1x128xf32> to vector<1x128xf32>
    %19 = vector.broadcast %18 : vector<1x128xf32> to vector<32x128xf32>
    %20 = arith.mulf %16, %19 : vector<32x128xf32>
    %c3 = arith.constant 3 : index
    %c0_12 = arith.constant 0 : index
    %21 = vector.load %arg4[%c3, %c0_12] : memref<5x128xf32, #tpu.memory_space<vmem>>, vector<1x128xf32>
    %22 = vector.broadcast %21 : vector<1x128xf32> to vector<32x128xf32>
    %23 = arith.mulf %20, %22 : vector<32x128xf32>
    %c4 = arith.constant 4 : index
    %c0_13 = arith.constant 0 : index
    %24 = vector.load %arg4[%c4, %c0_13] : memref<5x128xf32, #tpu.memory_space<vmem>>, vector<1x128xf32>
    %25 = vector.broadcast %24 : vector<1x128xf32> to vector<32x128xf32>
    %26 = arith.addf %23, %25 : vector<32x128xf32>
    %cst_14 = arith.constant 0.000000e+00 : f32
    %27 = vector.broadcast %cst_14 : f32 to vector<32x128xf32>
    %28 = arith.cmpf oge, %26, %27 : vector<32x128xf32>
    %cst_15 = arith.constant 0.00999999977 : f32
    %29 = vector.broadcast %cst_15 : f32 to vector<32x128xf32>
    %30 = arith.mulf %29, %26 : vector<32x128xf32>
    %31 = arith.select %28, %26, %30 : vector<32x128xi1>, vector<32x128xf32>
    %c0_16 = arith.constant 0 : index
    %c0_17 = arith.constant 0 : index
    %32 = vector.load %arg6[%c0_16, %c0_17] : memref<32x128xf32, #tpu.memory_space<vmem>>, vector<32x128xf32>
    tpu.vector_store %arg6[%c0_16, %c0_17], %31 {strides = array<i32>} : memref<32x128xf32, #tpu.memory_space<vmem>>, vector<32x128xf32>,
    return
  }
  func.func @transform_0(%arg0: i32, %arg1: i32) -> (i32, i32) {
    %c1_i32 = arith.constant 1 : i32
    %0 = arith.muli %arg0, %c1_i32 : i32
    %1 = arith.addi %0, %arg1 : i32
    %c0_i32 = arith.constant 0 : i32
    %c0_i32_0 = arith.constant 0 : i32
    return %1, %c0_i32 : i32, i32
  }
  func.func @transform_1(%arg0: i32, %arg1: i32) -> (i32, i32) {
    %c0_i32 = arith.constant 0 : i32
    %c0_i32_0 = arith.constant 0 : i32
    %c0_i32_1 = arith.constant 0 : i32
    return %c0_i32, %c0_i32_0 : i32, i32
  }
  func.func @transform_2(%arg0: i32, %arg1: i32) -> (i32, i32) {
    %c0_i32 = arith.constant 0 : i32
    %c0_i32_0 = arith.constant 0 : i32
    %c0_i32_1 = arith.constant 0 : i32
    return %c0_i32, %c0_i32_0 : i32, i32
  }
  func.func @transform_3(%arg0: i32, %arg1: i32) -> (i32, i32, i32) {
    %c0_i32 = arith.constant 0 : i32
    %c0_i32_0 = arith.constant 0 : i32
    %c0_i32_1 = arith.constant 0 : i32
    return %arg0, %c0_i32, %c0_i32_0 : i32, i32, i32
  }
  func.func @transform_4(%arg0: i32, %arg1: i32) -> (i32, i32) {
    %c1_i32 = arith.constant 1 : i32
    %0 = arith.muli %arg0, %c1_i32 : i32
    %1 = arith.addi %0, %arg1 : i32
    %c0_i32 = arith.constant 0 : i32
    %c0_i32_0 = arith.constant 0 : i32
    return %1, %c0_i32 : i32, i32
  }
}

</mosaic_0001>

<bundles_post_ra>
// kernel: mul.4
= control target key start
LH: loop header
LB: loop body
LE: loop exit
PB: predicated region body
PF: predicated region fallthrough
CT: control target
= control target key end

     0   :  { %vm39_vm0 = vcmask 130048   ;;  %s170_s0 = inlined_call_operand.vmem [shape: f32[3,3,4,16], index: 0, kind: input, shape index: {}]   ;;  %s171_s1 = inlined_call_operand.vmem [shape: f32[36,16], index: 1, kind: output, shape index: {}]  }
   0x1   :  { %v81_v0 = vld [vmem:[%s170_s0 + $0x20] sm:$0xf]  ;;  %v82_v1 = vld [vmem:[%s170_s0 + $0x1c] sm:$0xf]  ;;  %v83_v2 = vld [vmem:[%s170_s0 + $0x18] sm:$0xf] }
   0x2   :  { %7 = vst [vmem:[#allocation0 + $0x10] sm:$0xf] %v81_v0  ;;  %v84_v3 = vld [vmem:[%s170_s0 + $0x14] sm:$0xf]  ;;  %v85_v4 = vld [vmem:[%s170_s0 + $0x10] sm:$0xf] }
   0x3   :  { %11 = vst [vmem:[#allocation0 + $0x40] sm:$0xf] %v82_v1  ;;  %v86_v5 = vld [vmem:[%s170_s0 + $0xc] sm:$0xf]  ;;  %v87_v6 = vld [vmem:[%s170_s0 + $0x8] sm:$0xf] }
   0x4   :  { %15 = vst [vmem:[#allocation0 + $0x28] sm:$0xf] %v83_v2  ;;  %v88_v7 = vld [vmem:[%s170_s0 + $0x4] sm:$0xf]  ;;  %v36_v8 = vld [vmem:[%s170_s0] sm:$0xf] }
   0x5   :  { %19 = vst [vmem:[#allocation0 + $0x30] sm:$0xf] %v84_v3 }
   0x6   :  { %23 = vst [vmem:[#allocation0 + $0x20] sm:$0xf] %v85_v4 }
   0x7   :  { %27 = vst [vmem:[#allocation0 + $0x18] sm:$0xf] %v86_v5 }
   0x8   :  { %31 = vst [vmem:[#allocation0] sm:$0xf] %v87_v6 }
   0x9   :  { %35 = vst [vmem:[#allocation0 + $0x8] sm:$0xf] %v88_v7  ;;  %v77_v16 = vld [vmem:[#allocation0 + $0x10] sm:$0xf]  }
   0xa   :  { %37 = vst [vmem:[#allocation0 + $0x38] sm:$0xf] %v36_v8  ;;  %v72_v9 = vld [vmem:[#allocation0 + $0x40] sm:$0xf]  }
   0xb   :  { %v67_v10 = vld [vmem:[#allocation0 + $0x28] sm:$0xf]   ;;  %95 = vst.msk [vmem:[%s171_s1 + $0x1c] sm:$0xf] %vm39_vm0, %v72_v9  }
   0xc   :  { %v62_v11 = vld [vmem:[#allocation0 + $0x30] sm:$0xf]   ;;  %94 = vst.msk [vmem:[%s171_s1 + $0x18] sm:$0xf] %vm39_vm0, %v67_v10  }
   0xd   :  { %v57_v12 = vld [vmem:[#allocation0 + $0x20] sm:$0xf]   ;;  %93 = vst.msk [vmem:[%s171_s1 + $0x14] sm:$0xf] %vm39_vm0, %v62_v11  }
   0xe   :  { %v52_v13 = vld [vmem:[#allocation0 + $0x18] sm:$0xf]   ;;  %92 = vst.msk [vmem:[%s171_s1 + $0x10] sm:$0xf] %vm39_vm0, %v57_v12  }
   0xf   :  { %v47_v14 = vld [vmem:[#allocation0] sm:$0xf]   ;;  %91 = vst.msk [vmem:[%s171_s1 + $0xc] sm:$0xf] %vm39_vm0, %v52_v13  }
  0x10   :  { %v42_v15 = vld [vmem:[#allocation0 + $0x8] sm:$0xf]   ;;  %90 = vst.msk [vmem:[%s171_s1 + $0x8] sm:$0xf] %vm39_vm0, %v47_v14  }
  0x11   :  { %v38_v17 = vld [vmem:[#allocation0 + $0x38] sm:$0xf]   ;;  %89 = vst.msk [vmem:[%s171_s1 + $0x4] sm:$0xf] %vm39_vm0, %v42_v15  }
  0x12   :  { %40 = vst.msk [vmem:[%s171_s1] sm:$0xf] %vm39_vm0, %v38_v17  }
  0x13   :  { %96 = vst.msk [vmem:[%s171_s1 + $0x20] sm:$0xf] %vm39_vm0, %v77_v16  }

// kernel: _lambda_.2
= control target key start
LH: loop header
LB: loop body
LE: loop exit
PB: predicated region body
PF: predicated region fallthrough
CT: control target
= control target key end

     0   :  { %s1326_s18 = smov 0   ;;  %s1328_s19 = smov 0   ;;  %s1767_s0 = inlined_call_operand.vmem [shape: bf16[512,36], index: 0, kind: input, shape index: {}]   ;;  %s1768_s1 = inlined_call_operand.vmem [shape: bf16[36,128], index: 1, kind: input, shape index: {}]   ;;  %s1769_s2 = inlined_call_operand.vmem [shape: f32[3,128], index: 2, kind: input, shape index: {}]   ;;  %s1770_s3 = inlined_call_operand.vmem [shape: f32[2,128], index: 3, kind: output, shape index: {0}]   ;;  %s1771_s4 = inlined_call_operand.vmem [shape: f32[2,1,128], index: 4, kind: output, shape index: {1}]   ;;  %s1772_s5 = inlined_call_operand.vmem [shape: f32[2,1,128], index: 5, kind: output, shape index: {2}]  }
   0x1   :  { %s1330_s20 = smov 0   ;;  %s1332_s21 = smov 0  }
   0x2   :  { %s1334_s22 = smov 0  }
   0x3 LB: > { %s31_s23 = sadd.s32 1, %s1285_s20  ;;  %s35_s24 = sadd.s32 1, %s1289_s21  ;;  %s1293_s22 = sphi %s1334_s22, %s16_s22   ;;  %s1289_s21 = sphi %s1332_s21, %s1777_s21   ;;  %s1285_s20 = sphi %s1330_s20, %s1776_s20   ;;  %s1281_s19 = sphi %s1328_s19, %s1775_s19   ;;  %s1277_s18 = sphi %s1326_s18, %s1774_s18  }
   0x4   : > { %p33_p0 = scmp.ge.s32.totalorder %s31_s23, 2  ;;  %p1081_p1 = scmp.ge.s32.totalorder %s1293_s22, 1 }
   0x5   : > { %p211_p2 = scmp.lt.s32.totalorder %s1293_s22, 5 }
   0x6   : > { %s1779_s23 = smov (%p33_p0, %s31_s23), 0  ;;  %s1781_s24 = smov (!%p33_p0, %s35_s24), %s1289_s21 }
   0x7   : > { %p212_p3 = pnand %p1081_p1, %p211_p2  ;;  %p37_p4 = scmp.ge.s32.totalorder %s1781_s24, 2 }
   0x8   : > { %p249_p5 = scmp.lt.s32.totalorder (!%p212_p3), %s1277_s18, 1  ;;  %s1082_s27 = sshll.u32 (!%p212_p3), %s1277_s18, 5 }
   0x9   : > { %s1783_s24 = smov (%p37_p4, %s1781_s24), 0  ;;  %215 = sbr.rel (%p212_p3) target bundleno = 452 (0x1c4), region = 32 }
   0xa   : > { %p243_p6 = scmp.lt.s32.totalorder (!%p212_p3), %s1082_s27, 63  ;;  %p532_p7 = scmp.eq.s32.totalorder (!%p212_p3), %s1281_s19, 0 }
   0xb   : > { %p533_p8 = scmp.eq.s32.totalorder (!%p212_p3), %s1277_s18, 0  ;;  %p539_p11 = scmp.eq.s32.totalorder (!%p212_p3), %s1281_s19, 1 }
   0xd   : > { %p537_p9 = pnand (!%p212_p3), %p533_p8, %p532_p7 }
   0xe   : > { %v292_v0 = vld [vmem:[%s1768_s1 + $0x10] sm:$0x3]  ;;  %s1366_s28 = scalar_select %p249_p5, %s1277_s18, 1  ;;  %vm439_vm0 = vcmask 1041408   ;;  %v1196_v4 = vld [vmem:[%s1768_s1 + $0x8] sm:$0xff]  ;;  %v1195_v5 = vld [vmem:[%s1768_s1] sm:$0xff] }
   0xf   : > { %v384_v1 = vunpack.c.l.b16 %v292_v0  ;;  %s1785_s27 = smov (!%p243_p6, %s1082_s27), 63  ;;  %vm390_vm1 = vcmask 293888   ;;  %p538_p10 = pneg %p537_p9  ;;  %v1429_v22 = vld [vmem:[%s1769_s2] ss:$0 sm:$0xff] }
  0x10   : > { %s251_s6 = scalar_lea.vmem %s1771_s4, %s1366_s28  ;;  %s254_s9 = scalar_lea.vmem %s1772_s5, %s1366_s28 }
  0x11   : > { %v387_v2 = vpack.c.b16 %v384_v1, %v384_v1  ;;  %s1083_s12 = sshll.u32 %s1785_s27, 2  ;;  %p1422_p12 = por %p539_p11, %p538_p10 }
  0x12   : > { %s1385_s17 = scalar_lea.vmem %s1767_s0, %s1083_s12 }
  0x13   : > { %v441_v3 = vsel %vm439_vm0, %v387_v2, 0  ;;  %v1179_v6 = vld [vmem:[%s1385_s17] sm:$0xff]  ;;  %v1180_v10 = vld [vmem:[%s1385_s17 + $0x8] sm:$0xff]  ;;  %v1181_v14 = vld [vmem:[%s1385_s17 + $0x10] sm:$0xff] }
  0x14   : > { %448 = vmatpush.bf16.msra.mxu0 %v441_v3  ;;  %1200 = vmatpush.bf16.msra.mxu1 %v441_v3  ;;  %v1183_v7 = vld [vmem:[%s1385_s17 + $0x20] sm:$0xff]  ;;  %v1184_v11 = vld [vmem:[%s1385_s17 + $0x28] sm:$0xff]  ;;  %v1185_v15 = vld [vmem:[%s1385_s17 + $0x30] sm:$0xff] }
  0x15   : > { %1201 = vmatpush.bf16.msra.mxu2 %v441_v3  ;;  %1202 = vmatpush.bf16.msra.mxu3 %v441_v3  ;;  %v1187_v8 = vld [vmem:[%s1385_s17 + $0x40] sm:$0xff]  ;;  %v1188_v12 = vld [vmem:[%s1385_s17 + $0x48] sm:$0xff]  ;;  %v1189_v16 = vld [vmem:[%s1385_s17 + $0x50] sm:$0xff] }
  0x16   : > { %v1191_v9 = vld [vmem:[%s1385_s17 + $0x60] sm:$0xff]  ;;  %v1192_v13 = vld [vmem:[%s1385_s17 + $0x68] sm:$0xff]  ;;  %v1193_v17 = vld [vmem:[%s1385_s17 + $0x70] sm:$0xff] }
  0x17   : > { %v1182_v18 = vld [vmem:[%s1385_s17 + $0x18] sm:$0xff] }
  0x18   : > { %449 = vmatpush.bf16.msra.mxu0 %v1196_v4  ;;  %1203 = vmatpush.bf16.msra.mxu1 %v1196_v4  ;;  %v1186_v19 = vld [vmem:[%s1385_s17 + $0x38] sm:$0xff] }
  0x19   : > { %1204 = vmatpush.bf16.msra.mxu2 %v1196_v4  ;;  %1205 = vmatpush.bf16.msra.mxu3 %v1196_v4  ;;  %v1190_v20 = vld [vmem:[%s1385_s17 + $0x58] sm:$0xff] }
  0x1a   : > { %v1194_v21 = vld [vmem:[%s1385_s17 + $0x78] sm:$0xff] }
  0x1c   : > { %450 = vmatpush.bf16.msra.mxu0 %v1195_v5  ;;  %1206 = vmatpush.bf16.msra.mxu1 %v1195_v5 }
  0x1d   : > { %1207 = vmatpush.bf16.msra.mxu2 %v1195_v5  ;;  %1208 = vmatpush.bf16.msra.mxu3 %v1195_v5 }
  0x1f   : > { %1156 = vmatmul.msk.bf16.vlgmr.msra.gmra.mxu0 %vm390_vm1, %v1179_v6  ;;  %1160 = vmatmul.msk.bf16.vlgmr.msra.gmra.mxu1 %vm390_vm1, %v1183_v7 }
  0x20   : > { %1164 = vmatmul.msk.bf16.vlgmr.msra.gmra.mxu2 %vm390_vm1, %v1187_v8  ;;  %1168 = vmatmul.msk.bf16.vlgmr.msra.gmra.mxu3 %vm390_vm1, %v1191_v9 }
  0x2f   : > { %1157 = vmatmul.msk.bf16.gmra.mxu0 %vm390_vm1, %v1180_v10  ;;  %1161 = vmatmul.msk.bf16.gmra.mxu1 %vm390_vm1, %v1184_v11 }
  0x30   : > { %1165 = vmatmul.msk.bf16.gmra.mxu2 %vm390_vm1, %v1188_v12  ;;  %1169 = vmatmul.msk.bf16.gmra.mxu3 %vm390_vm1, %v1192_v13 }
  0x3f   : > { %1158 = vmatmul.msk.bf16.gmra.mxu0 %vm390_vm1, %v1181_v14  ;;  %1162 = vmatmul.msk.bf16.gmra.mxu1 %vm390_vm1, %v1185_v15 }
  0x40   : > { %1166 = vmatmul.msk.bf16.gmra.mxu2 %vm390_vm1, %v1189_v16  ;;  %1170 = vmatmul.msk.bf16.gmra.mxu3 %vm390_vm1, %v1193_v17 }
  0x4f   : > { %1159 = vmatmul.msk.bf16.gmra.mxu0 %vm390_vm1, %v1182_v18  ;;  %1163 = vmatmul.msk.bf16.gmra.mxu1 %vm390_vm1, %v1186_v19 }
  0x50   : > { %1167 = vmatmul.msk.bf16.gmra.mxu2 %vm390_vm1, %v1190_v20  ;;  %1171 = vmatmul.msk.bf16.gmra.mxu3 %vm390_vm1, %v1194_v21 }
  0x9c   : > { %v452_v23 = vpop.f32.mrf.mxu0  ;;  %v472_v24 = vpop.f32.mrf.mxu1 }
  0x9d   : > { %v1432_v25 = vadd.f32 %v1429_v22, %v452_v23  ;;  %v1435_v26 = vadd.f32 %v1429_v22, %v472_v24  ;;  %v1295_v24 = vmov (%p1422_p12), 0.0  }
  0x9e   : > { %546 = vst [vmem:[#allocation2] sm:$0x1] (%p1422_p12), %v1295_v24 }
  0x9f   : > { %547 = vst [vmem:[#allocation3] sm:$0x1] (%p1422_p12), %v1295_v24 }
  0xa3   : > { %v492_v27 = vpop.f32.mrf.mxu2  ;;  %v512_v28 = vpop.f32.mrf.mxu3 }
  0xa4   : > { %v1438_v29 = vadd.f32 %v1429_v22, %v492_v27  ;;  %v1441_v30 = vadd.f32 %v1429_v22, %v512_v28  ;;  %v454_v31 = vpop.f32.mrf.mxu0  ;;  %v474_v32 = vpop.f32.mrf.mxu1 }
  0xa5   : > { %v1444_v33 = vadd.f32 %v1429_v22, %v454_v31  ;;  %v1447_v34 = vadd.f32 %v1429_v22, %v474_v32 }
  0xab   : > { %v494_v35 = vpop.f32.mrf.mxu2  ;;  %v514_v36 = vpop.f32.mrf.mxu3 }
  0xac   : > { %v1450_v37 = vadd.f32 %v1429_v22, %v494_v35  ;;  %v1453_v38 = vadd.f32 %v1429_v22, %v514_v36  ;;  %v457_v39 = vpop.f32.mrf.mxu0  ;;  %v477_v40 = vpop.f32.mrf.mxu1 }
  0xad   : > { %v1456_v41 = vadd.f32 %v1429_v22, %v457_v39  ;;  %v1459_v42 = vadd.f32 %v1429_v22, %v477_v40 }
  0xb3   : > { %v497_v43 = vpop.f32.mrf.mxu2  ;;  %v517_v44 = vpop.f32.mrf.mxu3 }
  0xb4   : > { %v1462_v45 = vadd.f32 %v1429_v22, %v497_v43  ;;  %v1465_v46 = vadd.f32 %v1429_v22, %v517_v44  ;;  %v459_v47 = vpop.f32.mrf.mxu0  ;;  %v479_v48 = vpop.f32.mrf.mxu1 }
  0xb5   : > { %v1468_v49 = vadd.f32 %v1429_v22, %v459_v47  ;;  %v1471_v50 = vadd.f32 %v1429_v22, %v479_v48 }
  0xbb   : > { %v499_v51 = vpop.f32.mrf.mxu2  ;;  %v519_v52 = vpop.f32.mrf.mxu3 }
  0xbc   : > { %v1474_v53 = vadd.f32 %v1429_v22, %v499_v51  ;;  %v1477_v54 = vadd.f32 %v1429_v22, %v519_v52  ;;  %v462_v55 = vpop.f32.mrf.mxu0  ;;  %v482_v56 = vpop.f32.mrf.mxu1 }
  0xbd   : > { %v1480_v57 = vadd.f32 %v1429_v22, %v462_v55  ;;  %v1483_v58 = vadd.f32 %v1429_v22, %v482_v56 }
  0xc3   : > { %v502_v59 = vpop.f32.mrf.mxu2  ;;  %v522_v60 = vpop.f32.mrf.mxu3 }
  0xc4   : > { %v1486_v61 = vadd.f32 %v1429_v22, %v502_v59  ;;  %v1489_v62 = vadd.f32 %v1429_v22, %v522_v60  ;;  %v464_v63 = vpop.f32.mrf.mxu0  ;;  %v484_v0 = vpop.f32.mrf.mxu1 }
  0xc5   : > { %v1492_v1 = vadd.f32 %v1429_v22, %v464_v63  ;;  %v1495_v2 = vadd.f32 %v1429_v22, %v484_v0 }
  0xcb   : > { %v504_v3 = vpop.f32.mrf.mxu2  ;;  %v524_v4 = vpop.f32.mrf.mxu3 }
  0xcc   : > { %v1498_v5 = vadd.f32 %v1429_v22, %v504_v3  ;;  %v1501_v6 = vadd.f32 %v1429_v22, %v524_v4  ;;  %v467_v7 = vpop.f32.mrf.mxu0  ;;  %v487_v8 = vpop.f32.mrf.mxu1 }
  0xcd   : > { %v1504_v9 = vadd.f32 %v1429_v22, %v467_v7  ;;  %v1507_v10 = vadd.f32 %v1429_v22, %v487_v8 }
  0xd3   : > { %v507_v11 = vpop.f32.mrf.mxu2  ;;  %v527_v12 = vpop.f32.mrf.mxu3 }
  0xd4   : > { %v1510_v13 = vadd.f32 %v1429_v22, %v507_v11  ;;  %v1513_v14 = vadd.f32 %v1429_v22, %v527_v12  ;;  %v469_v15 = vpop.f32.mrf.mxu0  ;;  %v489_v16 = vpop.f32.mrf.mxu1 }
  0xd5   : > { %v1516_v17 = vadd.f32 %v1429_v22, %v469_v15  ;;  %v1519_v18 = vadd.f32 %v1429_v22, %v489_v16 }
  0xd8   : > { %545 = sbr.rel (!%p1422_p12) target bundleno = 221 (0xdd), region = 36 }
  0xdb   : > { %v509_v19 = vpop.f32.mrf.mxu2  ;;  %v529_v20 = vpop.f32.mrf.mxu3 }
  0xdc   : > { %v1522_v21 = vadd.f32 %v1429_v22, %v509_v19  ;;  %v1525_v23 = vadd.f32 %v1429_v22, %v529_v20 }
  0xdd PF: > { %p1174_p13 = scmp.ne.s32.totalorder %s1281_s19, 0 }
  0xde   : > { %p663_p0 = scmp.eq.s32.totalorder (!%p1174_p13), %s1277_s18, 1 }
  0xdf   : > { %550 = sbr.rel (%p1174_p13) target bundleno = 348 (0x15c), region = 40 }
  0xe4   : > { %v552_v27 = vadd.f32 %v1444_v33, %v1432_v25  ;;  %v592_v28 = vmul.f32 %v1432_v25, %v1432_v25  ;;  %v593_v22 = vmul.f32 %v1444_v33, %v1444_v33  ;;  %v594_v32 = vmul.f32 %v1456_v41, %v1456_v41 }
  0xe5   : > { %v595_v36 = vmul.f32 %v1468_v49, %v1468_v49  ;;  %v596_v43 = vmul.f32 %v1480_v57, %v1480_v57  ;;  %v597_v48 = vmul.f32 %v1492_v1, %v1492_v1  ;;  %v598_v55 = vmul.f32 %v1504_v9, %v1504_v9 }
  0xe6   : > { %v553_v31 = vadd.f32 %v552_v27, %v1456_v41  ;;  %v624_v39 = vadd.f32 %v593_v22, %v592_v28  ;;  %v599_v60 = vmul.f32 %v1516_v17, %v1516_v17  ;;  %v600_v3 = vmul.f32 %v1435_v26, %v1435_v26 }
  0xe7   : > { %v601_v8 = vmul.f32 %v1447_v34, %v1447_v34  ;;  %v602_v15 = vmul.f32 %v1459_v42, %v1459_v42  ;;  %v603_v20 = vmul.f32 %v1471_v50, %v1471_v50  ;;  %v604_v28 = vmul.f32 %v1483_v58, %v1483_v58 }
  0xe8   : > { %v554_v35 = vadd.f32 %v553_v31, %v1468_v49  ;;  %v625_v44 = vadd.f32 %v624_v39, %v594_v32  ;;  %v605_v32 = vmul.f32 %v1495_v2, %v1495_v2  ;;  %v606_v39 = vmul.f32 %v1507_v10, %v1507_v10 }
  0xea   : > { %v555_v40 = vadd.f32 %v554_v35, %v1480_v57  ;;  %v626_v51 = vadd.f32 %v625_v44, %v595_v36  ;;  %v607_v44 = vmul.f32 %v1519_v18, %v1519_v18 }
  0xec   : > { %v556_v47 = vadd.f32 %v555_v40, %v1492_v1  ;;  %v627_v56 = vadd.f32 %v626_v51, %v596_v43  ;;  %v608_v51 = vmul.f32 %v1438_v29, %v1438_v29 }
  0xee   : > { %v557_v52 = vadd.f32 %v556_v47, %v1504_v9  ;;  %v628_v63 = vadd.f32 %v627_v56, %v597_v48  ;;  %v609_v56 = vmul.f32 %v1450_v37, %v1450_v37 }
  0xf0   : > { %v558_v59 = vadd.f32 %v557_v52, %v1516_v17  ;;  %v629_v4 = vadd.f32 %v628_v63, %v598_v55  ;;  %v610_v63 = vmul.f32 %v1462_v45, %v1462_v45 }
  0xf2   : > { %v559_v0 = vadd.f32 %v558_v59, %v1435_v26  ;;  %v630_v11 = vadd.f32 %v629_v4, %v599_v60  ;;  %v611_v4 = vmul.f32 %v1474_v53, %v1474_v53 }
  0xf4   : > { %v560_v7 = vadd.f32 %v559_v0, %v1447_v34  ;;  %v631_v16 = vadd.f32 %v630_v11, %v600_v3  ;;  %v612_v11 = vmul.f32 %v1486_v61, %v1486_v61 }
  0xf6   : > { %v561_v12 = vadd.f32 %v560_v7, %v1459_v42  ;;  %v632_v24 = vadd.f32 %v631_v16, %v601_v8  ;;  %v613_v16 = vmul.f32 %v1498_v5, %v1498_v5 }
  0xf8   : > { %v562_v19 = vadd.f32 %v561_v12, %v1471_v50  ;;  %v633_v22 = vadd.f32 %v632_v24, %v602_v15  ;;  %v614_v24 = vmul.f32 %v1510_v13, %v1510_v13 }
  0xfa   : > { %v563_v27 = vadd.f32 %v562_v19, %v1483_v58  ;;  %v634_v35 = vadd.f32 %v633_v22, %v603_v20  ;;  %v615_v22 = vmul.f32 %v1522_v21, %v1522_v21 }
  0xfc   : > { %v564_v31 = vadd.f32 %v563_v27, %v1495_v2  ;;  %v635_v40 = vadd.f32 %v634_v35, %v604_v28  ;;  %v616_v35 = vmul.f32 %v1441_v30, %v1441_v30 }
  0xfe   : > { %v565_v36 = vadd.f32 %v564_v31, %v1507_v10  ;;  %v636_v47 = vadd.f32 %v635_v40, %v605_v32  ;;  %v617_v40 = vmul.f32 %v1453_v38, %v1453_v38 }
 0x100   : > { %v566_v43 = vadd.f32 %v565_v36, %v1519_v18  ;;  %v637_v52 = vadd.f32 %v636_v47, %v606_v39  ;;  %v618_v47 = vmul.f32 %v1465_v46, %v1465_v46 }
 0x102   : > { %v567_v48 = vadd.f32 %v566_v43, %v1438_v29  ;;  %v638_v59 = vadd.f32 %v637_v52, %v607_v44  ;;  %v619_v52 = vmul.f32 %v1477_v54, %v1477_v54 }
 0x104   : > { %v568_v55 = vadd.f32 %v567_v48, %v1450_v37  ;;  %v639_v0 = vadd.f32 %v638_v59, %v608_v51  ;;  %v620_v59 = vmul.f32 %v1489_v62, %v1489_v62 }
 0x106   : > { %v569_v60 = vadd.f32 %v568_v55, %v1462_v45  ;;  %v640_v7 = vadd.f32 %v639_v0, %v609_v56  ;;  %v621_v0 = vmul.f32 %v1501_v6, %v1501_v6 }
 0x108   : > { %v570_v3 = vadd.f32 %v569_v60, %v1474_v53  ;;  %v641_v12 = vadd.f32 %v640_v7, %v610_v63  ;;  %v622_v7 = vmul.f32 %v1513_v14, %v1513_v14 }
 0x10a   : > { %v571_v8 = vadd.f32 %v570_v3, %v1486_v61  ;;  %v642_v19 = vadd.f32 %v641_v12, %v611_v4  ;;  %v623_v12 = vmul.f32 %v1525_v23, %v1525_v23 }
 0x10c   : > { %v572_v15 = vadd.f32 %v571_v8, %v1498_v5  ;;  %v643_v27 = vadd.f32 %v642_v19, %v612_v11 }
 0x10e   : > { %v573_v20 = vadd.f32 %v572_v15, %v1510_v13  ;;  %v644_v31 = vadd.f32 %v643_v27, %v613_v16 }
 0x110   : > { %v574_v28 = vadd.f32 %v573_v20, %v1522_v21  ;;  %v645_v36 = vadd.f32 %v644_v31, %v614_v24 }
 0x112   : > { %v575_v32 = vadd.f32 %v574_v28, %v1441_v30  ;;  %v646_v43 = vadd.f32 %v645_v36, %v615_v22 }
 0x114   : > { %v576_v39 = vadd.f32 %v575_v32, %v1453_v38  ;;  %v647_v48 = vadd.f32 %v646_v43, %v616_v35  ;;  %v551_v35 = vld [vmem:[#allocation2] sm:$0x1] }
 0x116   : > { %v577_v44 = vadd.f32 %v576_v39, %v1465_v46  ;;  %v648_v55 = vadd.f32 %v647_v48, %v617_v40 }
 0x118   : > { %v578_v51 = vadd.f32 %v577_v44, %v1477_v54  ;;  %v649_v60 = vadd.f32 %v648_v55, %v618_v47  ;;  %v591_v47 = vld [vmem:[#allocation3] sm:$0x1] }
 0x11a   : > { %v579_v56 = vadd.f32 %v578_v51, %v1489_v62  ;;  %v650_v3 = vadd.f32 %v649_v60, %v619_v52 }
 0x11c   : > { %v580_v63 = vadd.f32 %v579_v56, %v1501_v6  ;;  %v651_v8 = vadd.f32 %v650_v3, %v620_v59 }
 0x11e   : > { %v581_v4 = vadd.f32 %v580_v63, %v1513_v14  ;;  %v652_v15 = vadd.f32 %v651_v8, %v621_v0 }
 0x120   : > { %v582_v11 = vadd.f32 %v581_v4, %v1525_v23  ;;  %v653_v19 = vadd.f32 %v652_v15, %v622_v7  ;;  %v675_v15 = vld [vmem:[%s1769_s2 + $0x1] sm:$0x1] (%p663_p0) }
 0x122   : > { %v583_v16 = vrot.slane %v582_v11, 4  ;;  %v654_v24 = vadd.f32 %v653_v19, %v623_v12 }
 0x124   : > { %v584_v20 = vadd.f32 %v583_v16, %v582_v11  ;;  %v655_v28 = vrot.slane %v654_v24, 4 }
 0x126   : > { %v585_v27 = vrot.slane %v584_v20, 2  ;;  %v656_v31 = vadd.f32 %v655_v28, %v654_v24  ;;  %v688_v24 = vld [vmem:[%s1769_s2 + $0x2] sm:$0x1] (%p663_p0) }
 0x128   : > { %v586_v22 = vadd.f32 %v585_v27, %v584_v20  ;;  %v657_v36 = vrot.slane %v656_v31, 2 }
 0x12a   : > { %v587_v32 = vrot.slane %v586_v22, 1  ;;  %v658_v40 = vadd.f32 %v657_v36, %v656_v31 }
 0x12c   : > { %v588_v39 = vadd.f32 %v587_v32, %v586_v22  ;;  %v659_v44 = vrot.slane %v658_v40, 1 }
 0x12e   : > { %v589_v43 = vadd.f32 %v588_v39, %v551_v35  ;;  %v660_v48 = vadd.f32 %v659_v44, %v658_v40  ;;  %667 = sbr.rel (!%p663_p0) target bundleno = 348 (0x15c), region = 44 }
 0x130   : > { %590 = vst [vmem:[#allocation2] sm:$0x1] %v589_v43  ;;  %v661_v51 = vadd.f32 %v660_v48, %v591_v47 }
 0x132   : > { %662 = vst [vmem:[#allocation3] sm:$0x1] %v661_v51 }
 0x137   : > { %v668_v52 = vld [vmem:[#allocation2] sm:$0x1] }
 0x138   : > { %v669_v56 = vmul.f32 0.001953125, %v668_v52 }
 0x139   : > { %v670_v55 = vld [vmem:[#allocation3] sm:$0x1] }
 0x13a   : > { %v671_v59 = vmul.f32 0.001953125, %v670_v55  ;;  %v672_v60 = vmul.f32 %v669_v56, %v669_v56 }
 0x13c   : > { %v673_v63 = vsub.f32 %v671_v59, %v672_v60 }
 0x13e   : > { %v674_v0 = vmax.f32 %v673_v63, 0.0 }
 0x140   : > { %v676_v3 = vadd.f32 1e-05, %v674_v0 }
 0x142   : > { %1251 = vrsqrt.f32 %v676_v3  ;;  %vm683_vm2 = vweird.f32 %v676_v3 }
 0x148   : > { %v1252_v4 = vpop.eup %1251 }
 0x149   : > { %v678_v7 = vmul.f32 %v1252_v4, %v676_v3  ;;  %vm684_vm3 = vweird.f32 %v1252_v4 }
 0x14a   : > { %vm685_vm4 = vmor %vm683_vm2, %vm684_vm3 }
 0x14b   : > { %v679_v8 = vmul.f32 %v1252_v4, %v678_v7 }
 0x14d   : > { %v680_v11 = vmul.f32 0.5, %v679_v8 }
 0x14f   : > { %v681_v12 = vsub.f32 1.5, %v680_v11 }
 0x151   : > { %v682_v16 = vmul.f32 %v1252_v4, %v681_v12 }
 0x153   : > { %v686_v19 = vsel %vm685_vm4, %v1252_v4, %v682_v16 }
 0x154   : > { %v687_v20 = vmul.f32 %v686_v19, %v675_v15 }
 0x156   : > { %691 = vst [vmem:[#allocation4] sm:$0x1] %v687_v20  ;;  %v689_v27 = vmul.f32 %v687_v20, %v669_v56 }
 0x157   : > { %693 = vst [vmem:[%s1770_s3] sm:$0x1] %v687_v20 }
 0x158   : > { %v690_v28 = vsub.f32 %v688_v24, %v689_v27 }
 0x15a   : > { %692 = vst [vmem:[#allocation5] sm:$0x1] %v690_v28 }
 0x15b   : > { %694 = vst [vmem:[%s1770_s3 + $0x1] sm:$0x1] %v690_v28 }
 0x15c PF: > { %p1176_p1 = scmp.ne.s32.totalorder %s1281_s19, 1 }
 0x15e   : > { %697 = sbr.rel (%p1176_p1) target bundleno = 452 (0x1c4), region = 48 }
 0x163   : > { %v1642_v22 = vld [vmem:[#allocation4] ss:$0 sm:$0xff]  ;;  %v1648_v35 = vld [vmem:[#allocation5] ss:$0 sm:$0xff] }
 0x164   : > { %v702_v31 = vmul.f32 %v1642_v22, %v1432_v25  ;;  %v703_v32 = vmul.f32 %v1642_v22, %v1444_v33  ;;  %v704_v36 = vmul.f32 %v1642_v22, %v1456_v41  ;;  %v705_v39 = vmul.f32 %v1642_v22, %v1468_v49 }
 0x165   : > { %v706_v44 = vmul.f32 %v1642_v22, %v1480_v57  ;;  %v707_v33 = vmul.f32 %v1642_v22, %v1492_v1  ;;  %v708_v41 = vmul.f32 %v1642_v22, %v1504_v9  ;;  %v709_v57 = vmul.f32 %v1642_v22, %v1516_v17 }
 0x166   : > { %v738_v40 = vadd.f32 %v1648_v35, %v702_v31  ;;  %v739_v43 = vadd.f32 %v1648_v35, %v703_v32  ;;  %v740_v25 = vadd.f32 %v1648_v35, %v704_v36  ;;  %v741_v47 = vadd.f32 %v1648_v35, %v705_v39 }
 0x167   : > { %v742_v49 = vadd.f32 %v1648_v35, %v706_v44  ;;  %v743_v55 = vadd.f32 %v1648_v35, %v707_v33  ;;  %v710_v63 = vmul.f32 %v1642_v22, %v1435_v26  ;;  %v744_v0 = vadd.f32 %v1648_v35, %v708_v41 }
 0x168   : > { %v802_v48 = vmul.f32 0.01, %v738_v40  ;;  %v803_v51 = vmul.f32 0.01, %v739_v43  ;;  %vm770_vm5 = vcmp.ge.f32.partialorder %v738_v40, 0.0  ;;  %vm771_vm6 = vcmp.ge.f32.partialorder %v739_v43, 0.0 }
 0x169   : > { %v804_v52 = vmul.f32 0.01, %v740_v25  ;;  %vm772_vm7 = vcmp.ge.f32.partialorder %v740_v25, 0.0  ;;  %v805_v56 = vmul.f32 0.01, %v741_v47  ;;  %vm773_vm8 = vcmp.ge.f32.partialorder %v741_v47, 0.0 }
 0x16a   : > { %v834_v1 = vsel %vm770_vm5, %v738_v40, %v802_v48  ;;  %v835_v59 = vsel %vm771_vm6, %v739_v43, %v803_v51  ;;  %v806_v9 = vmul.f32 0.01, %v742_v49  ;;  %vm774_vm9 = vcmp.ge.f32.partialorder %v742_v49, 0.0 }
 0x16b   : > { %v867_v60 = vadd.f32 %v835_v59, %v834_v1  ;;  %v836_v3 = vsel %vm772_vm7, %v740_v25, %v804_v52  ;;  %v907_v7 = vmul.f32 %v834_v1, %v834_v1  ;;  %v908_v8 = vmul.f32 %v835_v59, %v835_v59 }
 0x16c   : > { %v711_v17 = vmul.f32 %v1642_v22, %v1447_v34  ;;  %v745_v11 = vadd.f32 %v1648_v35, %v709_v57  ;;  %v807_v12 = vmul.f32 0.01, %v743_v55  ;;  %v837_v15 = vsel %vm773_vm8, %v741_v47, %v805_v56 }
 0x16d   : > { %v868_v4 = vadd.f32 %v867_v60, %v836_v3  ;;  %vm775_vm10 = vcmp.ge.f32.partialorder %v743_v55, 0.0  ;;  %v909_v19 = vmul.f32 %v836_v3, %v836_v3  ;;  %v712_v26 = vmul.f32 %v1642_v22, %v1459_v42 }
 0x16e   : > { %v746_v20 = vadd.f32 %v1648_v35, %v710_v63  ;;  %v808_v24 = vmul.f32 0.01, %v744_v0  ;;  %v838_v27 = vsel %vm774_vm9, %v742_v49, %v806_v9  ;;  %vm776_vm11 = vcmp.ge.f32.partialorder %v744_v0, 0.0 }
 0x16f   : > { %v869_v16 = vadd.f32 %v868_v4, %v837_v15  ;;  %v910_v31 = vmul.f32 %v837_v15, %v837_v15  ;;  %v939_v32 = vadd.f32 %v908_v8, %v907_v7  ;;  %v713_v34 = vmul.f32 %v1642_v22, %v1471_v50 }
 0x170   : > { %v747_v36 = vadd.f32 %v1648_v35, %v711_v17  ;;  %v809_v39 = vmul.f32 0.01, %v745_v11  ;;  %v839_v40 = vsel %vm775_vm10, %v743_v55, %v807_v12  ;;  %vm777_vm12 = vcmp.ge.f32.partialorder %v745_v11, 0.0 }
 0x171   : > { %v870_v28 = vadd.f32 %v869_v16, %v838_v27  ;;  %v911_v44 = vmul.f32 %v838_v27, %v838_v27  ;;  %v940_v25 = vadd.f32 %v939_v32, %v909_v19  ;;  %v714_v42 = vmul.f32 %v1642_v22, %v1483_v58 }
 0x172   : > { %v748_v33 = vadd.f32 %v1648_v35, %v712_v26  ;;  %v810_v47 = vmul.f32 0.01, %v746_v20  ;;  %v840_v48 = vsel %vm776_vm11, %v744_v0, %v808_v24  ;;  %vm778_vm13 = vcmp.ge.f32.partialorder %v746_v20, 0.0 }
 0x173   : > { %v871_v43 = vadd.f32 %v870_v28, %v839_v40  ;;  %v912_v41 = vmul.f32 %v839_v40, %v839_v40  ;;  %v941_v49 = vadd.f32 %v940_v25, %v910_v31  ;;  %v715_v50 = vmul.f32 %v1642_v22, %v1495_v2 }
 0x174   : > { %v749_v52 = vadd.f32 %v1648_v35, %v713_v34  ;;  %v811_v57 = vmul.f32 0.01, %v747_v36  ;;  %v841_v55 = vsel %vm777_vm12, %v745_v11, %v809_v39  ;;  %vm779_vm14 = vcmp.ge.f32.partialorder %v747_v36, 0.0 }
 0x175   : > { %v872_v51 = vadd.f32 %v871_v43, %v840_v48  ;;  %v913_v1 = vmul.f32 %v840_v48, %v840_v48  ;;  %v942_v59 = vadd.f32 %v941_v49, %v911_v44  ;;  %v716_v58 = vmul.f32 %v1642_v22, %v1507_v10 }
 0x176   : > { %v750_v60 = vadd.f32 %v1648_v35, %v714_v42  ;;  %v812_v63 = vmul.f32 0.01, %v748_v33  ;;  %v842_v0 = vsel %vm778_vm13, %v746_v20, %v810_v47  ;;  %vm780_vm15 = vcmp.ge.f32.partialorder %v748_v33, 0.0 }
 0x177   : > { %v873_v56 = vadd.f32 %v872_v51, %v841_v55  ;;  %v914_v3 = vmul.f32 %v841_v55, %v841_v55  ;;  %v943_v4 = vadd.f32 %v942_v59, %v912_v41  ;;  %v717_v2 = vmul.f32 %v1642_v22, %v1519_v18 }
 0x178   : > { %v751_v7 = vadd.f32 %v1648_v35, %v715_v50  ;;  %v813_v8 = vmul.f32 0.01, %v749_v52  ;;  %v843_v17 = vsel %vm779_vm14, %v747_v36, %v811_v57  ;;  %vm781_vm0 = vcmp.ge.f32.partialorder %v749_v52, 0.0 }
 0x179   : > { %v874_v9 = vadd.f32 %v873_v56, %v842_v0  ;;  %v915_v12 = vmul.f32 %v842_v0, %v842_v0  ;;  %v944_v15 = vadd.f32 %v943_v4, %v913_v1  ;;  %v718_v10 = vmul.f32 %v1642_v22, %v1438_v29 }
 0x17a   : > { %v752_v16 = vadd.f32 %v1648_v35, %v716_v58  ;;  %v814_v19 = vmul.f32 0.01, %v750_v60  ;;  %v844_v26 = vsel %vm780_vm15, %v748_v33, %v812_v63  ;;  %vm782_vm1 = vcmp.ge.f32.partialorder %v750_v60, 0.0 }
 0x17b   : > { %v875_v11 = vadd.f32 %v874_v9, %v843_v17  ;;  %v916_v24 = vmul.f32 %v843_v17, %v843_v17  ;;  %v945_v27 = vadd.f32 %v944_v15, %v914_v3  ;;  %v719_v18 = vmul.f32 %v1642_v22, %v1450_v37 }
 0x17c   : > { %v753_v28 = vadd.f32 %v1648_v35, %v717_v2  ;;  %v815_v31 = vmul.f32 0.01, %v751_v7  ;;  %v845_v32 = vsel %vm781_vm0, %v749_v52, %v813_v8  ;;  %vm783_vm2 = vcmp.ge.f32.partialorder %v751_v7, 0.0 }
 0x17d   : > { %v876_v20 = vadd.f32 %v875_v11, %v844_v26  ;;  %v917_v36 = vmul.f32 %v844_v26, %v844_v26  ;;  %v946_v39 = vadd.f32 %v945_v27, %v915_v12  ;;  %v720_v29 = vmul.f32 %v1642_v22, %v1462_v45 }
 0x17e   : > { %v754_v40 = vadd.f32 %v1648_v35, %v718_v10  ;;  %v816_v43 = vmul.f32 0.01, %v752_v16  ;;  %v846_v44 = vsel %vm782_vm1, %v750_v60, %v814_v19  ;;  %vm784_vm3 = vcmp.ge.f32.partialorder %v752_v16, 0.0 }
 0x17f   : > { %v877_v34 = vadd.f32 %v876_v20, %v845_v32  ;;  %v918_v42 = vmul.f32 %v845_v32, %v845_v32  ;;  %v947_v33 = vadd.f32 %v946_v39, %v916_v24  ;;  %v721_v37 = vmul.f32 %v1642_v22, %v1474_v53 }
 0x180   : > { %v755_v47 = vadd.f32 %v1648_v35, %v719_v18  ;;  %v817_v48 = vmul.f32 0.01, %v753_v28  ;;  %v847_v51 = vsel %vm783_vm2, %v751_v7, %v815_v31  ;;  %vm785_vm4 = vcmp.ge.f32.partialorder %v753_v28, 0.0 }
 0x181   : > { %v878_v25 = vadd.f32 %v877_v34, %v846_v44  ;;  %v919_v49 = vmul.f32 %v846_v44, %v846_v44  ;;  %v948_v50 = vadd.f32 %v947_v33, %v917_v36  ;;  %v722_v45 = vmul.f32 %v1642_v22, %v1486_v61 }
 0x182   : > { %v756_v52 = vadd.f32 %v1648_v35, %v720_v29  ;;  %v818_v57 = vmul.f32 0.01, %v754_v40  ;;  %v848_v55 = vsel %vm784_vm3, %v752_v16, %v816_v43  ;;  %vm786_vm5 = vcmp.ge.f32.partialorder %v754_v40, 0.0 }
 0x183   : > { %v879_v41 = vadd.f32 %v878_v25, %v847_v51  ;;  %v920_v1 = vmul.f32 %v847_v51, %v847_v51  ;;  %v949_v59 = vadd.f32 %v948_v50, %v918_v42  ;;  %v723_v53 = vmul.f32 %v1642_v22, %v1498_v5 }
 0x184   : > { %v757_v58 = vadd.f32 %v1648_v35, %v721_v37  ;;  %v819_v60 = vmul.f32 0.01, %v755_v47  ;;  %v849_v63 = vsel %vm785_vm4, %v753_v28, %v817_v48  ;;  %vm787_vm6 = vcmp.ge.f32.partialorder %v755_v47, 0.0 }
 0x185   : > { %v880_v56 = vadd.f32 %v879_v41, %v848_v55  ;;  %v921_v9 = vmul.f32 %v848_v55, %v848_v55  ;;  %v950_v3 = vadd.f32 %v949_v59, %v919_v49  ;;  %v724_v61 = vmul.f32 %v1642_v22, %v1510_v13 }
 0x186   : > { %v758_v4 = vadd.f32 %v1648_v35, %v722_v45  ;;  %v820_v2 = vmul.f32 0.01, %v756_v52  ;;  %v850_v7 = vsel %vm786_vm5, %v754_v40, %v818_v57  ;;  %vm788_vm7 = vcmp.ge.f32.partialorder %v756_v52, 0.0 }
 0x187   : > { %v881_v0 = vadd.f32 %v880_v56, %v849_v63  ;;  %v922_v17 = vmul.f32 %v849_v63, %v849_v63  ;;  %v951_v11 = vadd.f32 %v950_v3, %v920_v1  ;;  %v725_v5 = vmul.f32 %v1642_v22, %v1522_v21 }
 0x188   : > { %v759_v12 = vadd.f32 %v1648_v35, %v723_v53  ;;  %v821_v15 = vmul.f32 0.01, %v757_v58  ;;  %v851_v10 = vsel %vm787_vm6, %v755_v47, %v819_v60  ;;  %vm789_vm8 = vcmp.ge.f32.partialorder %v757_v58, 0.0 }
 0x189   : > { %v882_v8 = vadd.f32 %v881_v0, %v850_v7  ;;  %v923_v19 = vmul.f32 %v850_v7, %v850_v7  ;;  %v952_v26 = vadd.f32 %v951_v11, %v921_v9  ;;  %v726_v13 = vmul.f32 %v1642_v22, %v1441_v30 }
 0x18a   : > { %v760_v20 = vadd.f32 %v1648_v35, %v724_v61  ;;  %v822_v24 = vmul.f32 0.01, %v758_v4  ;;  %v852_v27 = vsel %vm788_vm7, %v756_v52, %v820_v2  ;;  %vm790_vm9 = vcmp.ge.f32.partialorder %v758_v4, 0.0 }
 0x18b   : > { %v883_v16 = vadd.f32 %v882_v8, %v851_v10  ;;  %v924_v28 = vmul.f32 %v851_v10, %v851_v10  ;;  %v953_v31 = vadd.f32 %v952_v26, %v922_v17  ;;  %v727_v21 = vmul.f32 %v1642_v22, %v1453_v38 }
 0x18c   : > { %v761_v32 = vadd.f32 %v1648_v35, %v725_v5  ;;  %v823_v34 = vmul.f32 0.01, %v759_v12  ;;  %v853_v36 = vsel %vm789_vm8, %v757_v58, %v821_v15  ;;  %vm791_vm10 = vcmp.ge.f32.partialorder %v759_v12, 0.0 }
 0x18d   : > { %v884_v18 = vadd.f32 %v883_v16, %v852_v27  ;;  %v925_v29 = vmul.f32 %v852_v27, %v852_v27  ;;  %v954_v40 = vadd.f32 %v953_v31, %v923_v19  ;;  %v728_v30 = vmul.f32 %v1642_v22, %v1465_v46 }
 0x18e   : > { %v762_v43 = vadd.f32 %v1648_v35, %v726_v13  ;;  %v824_v44 = vmul.f32 0.01, %v760_v20  ;;  %v854_v25 = vsel %vm790_vm9, %v758_v4, %v822_v24  ;;  %vm792_vm11 = vcmp.ge.f32.partialorder %v760_v20, 0.0 }
 0x18f   : > { %v885_v39 = vadd.f32 %v884_v18, %v853_v36  ;;  %v926_v33 = vmul.f32 %v853_v36, %v853_v36  ;;  %v955_v37 = vadd.f32 %v954_v40, %v924_v28  ;;  %v729_v38 = vmul.f32 %v1642_v22, %v1477_v54 }
 0x190   : > { %v763_v47 = vadd.f32 %v1648_v35, %v727_v21  ;;  %v825_v48 = vmul.f32 0.01, %v761_v32  ;;  %v855_v51 = vsel %vm791_vm10, %v759_v12, %v823_v34  ;;  %vm793_vm12 = vcmp.ge.f32.partialorder %v761_v32, 0.0 }
 0x191   : > { %v886_v42 = vadd.f32 %v885_v39, %v854_v25  ;;  %v927_v49 = vmul.f32 %v854_v25, %v854_v25  ;;  %v956_v50 = vadd.f32 %v955_v37, %v925_v29  ;;  %v730_v46 = vmul.f32 %v1642_v22, %v1489_v62 }
 0x192   : > { %v764_v45 = vadd.f32 %v1648_v35, %v728_v30  ;;  %v826_v52 = vmul.f32 0.01, %v762_v43  ;;  %v856_v57 = vsel %vm792_vm11, %v760_v20, %v824_v44  ;;  %vm794_vm13 = vcmp.ge.f32.partialorder %v762_v43, 0.0 }
 0x193   : > { %v887_v41 = vadd.f32 %v886_v42, %v855_v51  ;;  %v928_v56 = vmul.f32 %v855_v51, %v855_v51  ;;  %v957_v1 = vadd.f32 %v956_v50, %v926_v33  ;;  %v731_v54 = vmul.f32 %v1642_v22, %v1501_v6 }
 0x194   : > { %v765_v59 = vadd.f32 %v1648_v35, %v729_v38  ;;  %v827_v53 = vmul.f32 0.01, %v763_v47  ;;  %v857_v58 = vsel %vm793_vm12, %v761_v32, %v825_v48  ;;  %vm795_vm14 = vcmp.ge.f32.partialorder %v763_v47, 0.0 }
 0x195   : > { %v888_v55 = vadd.f32 %v887_v41, %v856_v57  ;;  %v929_v63 = vmul.f32 %v856_v57, %v856_v57  ;;  %v958_v0 = vadd.f32 %v957_v1, %v927_v49  ;;  %v732_v62 = vmul.f32 %v1642_v22, %v1513_v14 }
 0x196   : > { %v766_v9 = vadd.f32 %v1648_v35, %v730_v46  ;;  %v828_v3 = vmul.f32 0.01, %v764_v45  ;;  %v858_v61 = vsel %vm794_vm13, %v762_v43, %v826_v52  ;;  %vm796_vm15 = vcmp.ge.f32.partialorder %v764_v45, 0.0 }
 0x197   : > { %v889_v60 = vadd.f32 %v888_v55, %v857_v58  ;;  %v930_v2 = vmul.f32 %v857_v58, %v857_v58  ;;  %v959_v7 = vadd.f32 %v958_v0, %v928_v56  ;;  %v733_v6 = vmul.f32 %v1642_v22, %v1525_v23  ;;  %v866_v56 = vld [vmem:[#allocation2] sm:$0x1] }
 0x198   : > { %v767_v8 = vadd.f32 %v1648_v35, %v731_v54  ;;  %v829_v17 = vmul.f32 0.01, %v765_v59  ;;  %v859_v11 = vsel %vm795_vm14, %v763_v47, %v827_v53  ;;  %vm797_vm0 = vcmp.ge.f32.partialorder %v765_v59, 0.0 }
 0x199   : > { %v890_v4 = vadd.f32 %v889_v60, %v858_v61  ;;  %v931_v12 = vmul.f32 %v858_v61, %v858_v61  ;;  %v960_v15 = vadd.f32 %v959_v7, %v929_v63  ;;  %v768_v14 = vadd.f32 %v1648_v35, %v732_v62  ;;  %v906_v60 = vld [vmem:[#allocation3] sm:$0x1] }
 0x19a   : > { %v830_v10 = vmul.f32 0.01, %v766_v9  ;;  %v860_v16 = vsel %vm796_vm15, %v764_v45, %v828_v3  ;;  %vm798_vm1 = vcmp.ge.f32.partialorder %v766_v9, 0.0  ;;  %v932_v26 = vmul.f32 %v859_v11, %v859_v11 }
 0x19b   : > { %v891_v5 = vadd.f32 %v890_v4, %v859_v11  ;;  %v961_v13 = vadd.f32 %v960_v15, %v930_v2  ;;  %v769_v20 = vadd.f32 %v1648_v35, %v733_v6  ;;  %v831_v24 = vmul.f32 0.01, %v767_v8 }
 0x19c   : > { %v861_v23 = vsel %vm797_vm0, %v765_v59, %v829_v17  ;;  %vm799_vm2 = vcmp.ge.f32.partialorder %v767_v8, 0.0  ;;  %v933_v27 = vmul.f32 %v860_v16, %v860_v16  ;;  %v832_v28 = vmul.f32 0.01, %v768_v14 }
 0x19d   : > { %v892_v19 = vadd.f32 %v891_v5, %v860_v16  ;;  %v962_v18 = vadd.f32 %v961_v13, %v931_v12  ;;  %v862_v31 = vsel %vm798_vm1, %v766_v9, %v830_v10  ;;  %vm800_vm3 = vcmp.ge.f32.partialorder %v768_v14, 0.0 }
 0x19e   : > { %v934_v32 = vmul.f32 %v861_v23, %v861_v23  ;;  %v833_v36 = vmul.f32 0.01, %v769_v20  ;;  %v863_v39 = vsel %vm799_vm2, %v767_v8, %v831_v24  ;;  %vm801_vm4 = vcmp.ge.f32.partialorder %v769_v20, 0.0 }
 0x19f   : > { %v893_v22 = vadd.f32 %v892_v19, %v861_v23  ;;  %v963_v34 = vadd.f32 %v962_v18, %v932_v26  ;;  %v935_v40 = vmul.f32 %v862_v31, %v862_v31  ;;  %v864_v43 = vsel %vm800_vm3, %v768_v14, %v832_v28 }
 0x1a0   : > { %v936_v44 = vmul.f32 %v863_v39, %v863_v39  ;;  %v865_v42 = vsel %vm801_vm4, %v769_v20, %v833_v36  ;;  %v937_v37 = vmul.f32 %v864_v43, %v864_v43 }
 0x1a1   : > { %v894_v21 = vadd.f32 %v893_v22, %v862_v31  ;;  %v964_v30 = vadd.f32 %v963_v34, %v933_v27  ;;  %v938_v48 = vmul.f32 %v865_v42, %v865_v42 }
 0x1a3   : > { %v895_v29 = vadd.f32 %v894_v21, %v863_v39  ;;  %v965_v25 = vadd.f32 %v964_v30, %v934_v32 }
 0x1a5   : > { %v896_v35 = vadd.f32 %v895_v29, %v864_v43  ;;  %v966_v38 = vadd.f32 %v965_v25, %v935_v40 }
 0x1a7   : > { %v897_v33 = vadd.f32 %v896_v35, %v865_v42  ;;  %v967_v51 = vadd.f32 %v966_v38, %v936_v44 }
 0x1a9   : > { %v898_v47 = vrot.slane %v897_v33, 4  ;;  %v968_v49 = vadd.f32 %v967_v51, %v937_v37 }
 0x1ab   : > { %v899_v41 = vadd.f32 %v898_v47, %v897_v33  ;;  %v969_v46 = vadd.f32 %v968_v49, %v938_v48 }
 0x1ad   : > { %v900_v50 = vrot.slane %v899_v41, 2  ;;  %v970_v52 = vrot.slane %v969_v46, 4 }
 0x1af   : > { %v901_v45 = vadd.f32 %v900_v50, %v899_v41  ;;  %v971_v55 = vadd.f32 %v970_v52, %v969_v46 }
 0x1b1   : > { %v902_v57 = vrot.slane %v901_v45, 1  ;;  %v972_v54 = vrot.slane %v971_v55, 2 }
 0x1b3   : > { %v903_v1 = vadd.f32 %v902_v57, %v901_v45  ;;  %v973_v53 = vadd.f32 %v972_v54, %v971_v55 }
 0x1b5   : > { %v904_v59 = vadd.f32 %v903_v1, %v866_v56  ;;  %v974_v58 = vrot.slane %v973_v53, 1 }
 0x1b7   : > { %905 = vst [vmem:[#allocation2] sm:$0x1] %v904_v59  ;;  %v975_v63 = vadd.f32 %v974_v58, %v973_v53 }
 0x1b9   : > { %v976_v0 = vadd.f32 %v975_v63, %v906_v60 }
 0x1bb   : > { %977 = vst [vmem:[#allocation3] sm:$0x1] %v976_v0 }
 0x1be   : > { %v981_v62 = vld [vmem:[#allocation2] sm:$0x1] }
 0x1bf   : > { %982 = vst [vmem:[%s251_s6] sm:$0x1] %v981_v62 }
 0x1c2   : > { %v983_v9 = vld [vmem:[#allocation3] sm:$0x1] }
 0x1c3   : > { %984 = vst [vmem:[%s254_s9] sm:$0x1] %v983_v9 }
 0x1c4 PF: > { %s16_s22 = sadd.s32 1, %s1293_s22   ;;  %s1774_s18 = smov %s1285_s20 }
 0x1c5   : > { %p13_p2 = scmp.ge.s32.totalorder %s16_s22, 6   ;;  %s1775_s19 = smov %s1289_s21 }
 0x1c6   : > { %s1776_s20 = smov %s1779_s23  ;;  %s1777_s21 = smov %s1783_s24 }
 0x1c7   :  { %15 = sbr.rel (!%p13_p2) target bundleno = 3 (0x3), region = 102 }

// kernel: _lambda_.3
= control target key start
LH: loop header
LB: loop body
LE: loop exit
PB: predicated region body
PF: predicated region fallthrough
CT: control target
= control target key end

     0   :  { %s849_s15 = smov 0   ;;  %s851_s16 = smov 0   ;;  %s985_s0 = inlined_call_operand.vmem [shape: bf16[64,288], index: 0, kind: input, shape index: {}]   ;;  %s986_s1 = inlined_call_operand.vmem [shape: bf16[288,128], index: 1, kind: input, shape index: {}]   ;;  %s987_s2 = inlined_call_operand.vmem [shape: f32[5,128], index: 2, kind: input, shape index: {}]   ;;  %s988_s3 = inlined_call_operand.vmem [shape: f32[2,1,128], index: 3, kind: input, shape index: {}]   ;;  %s989_s4 = inlined_call_operand.vmem [shape: f32[64,128], index: 4, kind: output, shape index: {}]  }
   0x1   :  { %s853_s17 = smov 0  }
   0x2 LB: > { %s26_s18 = sadd.s32 1, %s818_s16  ;;  %p632_p0 = scmp.ge.s32.totalorder %s822_s17, 1  ;;  %s822_s17 = sphi %s853_s17, %s14_s17   ;;  %s818_s16 = sphi %s851_s16, %s991_s16   ;;  %s814_s15 = sphi %s849_s15, %s990_s15  }
   0x3   : > { %p28_p1 = scmp.ge.s32.totalorder %s26_s18, 2  ;;  %p190_p2 = scmp.lt.s32.totalorder %s822_s17, 3 }
   0x5   : > { %s993_s18 = smov (%p28_p1, %s26_s18), 0  ;;  %p191_p3 = pnand %p632_p0, %p190_p2 }
   0x6   : > { %s633_s23 = sshll.u32 (!%p191_p3), %s814_s15, 2  ;;  %p231_p5 = scmp.lt.s32.totalorder (!%p191_p3), %s814_s15, 1 }
   0x7   : > { %194 = sbr.rel (%p191_p3) target bundleno = 216 (0xd8), region = 36  ;;  %p224_p4 = scmp.lt.s32.totalorder (!%p191_p3), %s633_s23, 7 }
   0xc   : > { %v750_v0 = vld [vmem:[%s986_s1 + $0x38] sm:$0xff]  ;;  %v749_v2 = vld [vmem:[%s986_s1 + $0x30] sm:$0xff]  ;;  %v760_v3 = vld [vmem:[%s986_s1 + $0x88] sm:$0xff]  ;;  %s995_s23 = smov (!%p224_p4, %s633_s23), 7  ;;  %vm427_vm0 = vcmask 261120   ;;  %s997_s15 = smov (!%p231_p5, %s814_s15), 1 }
   0xd   : > { %v758_v1 = vld [vmem:[%s986_s1 + $0x78] sm:$0xff]  ;;  %434 = vmatpush.bf16.msra.mxu0 %v750_v0  ;;  %761 = vmatpush.bf16.msra.mxu3 %v750_v0  ;;  %v757_v4 = vld [vmem:[%s986_s1 + $0x70] sm:$0xff]  ;;  %v759_v5 = vld [vmem:[%s986_s1 + $0x80] sm:$0xff]  ;;  %s769_s8 = smul.u32 12, %s995_s23  ;;  %s233_s20 = scalar_lea.vmem %s988_s3, %s997_s15 }
   0xe   : > { %453 = vmatpush.bf16.msra.mxu1 %v758_v1  ;;  %478 = vmatpush.bf16.msra.mxu2 %v760_v3  ;;  %v748_v6 = vld [vmem:[%s986_s1 + $0x28] sm:$0xff]  ;;  %v747_v11 = vld [vmem:[%s986_s1 + $0x20] sm:$0xff]  ;;  %v746_v13 = vld [vmem:[%s986_s1 + $0x18] sm:$0xff]  ;;  %s636_s30 = sshll.u32 %s995_s23, 3 }
   0xf   : > { %v756_v7 = vld [vmem:[%s986_s1 + $0x68] sm:$0xff]  ;;  %s900_s13 = scalar_lea.vmem %s985_s0, %s769_s8  ;;  %v755_v12 = vld [vmem:[%s986_s1 + $0x60] sm:$0xff]  ;;  %v754_v14 = vld [vmem:[%s986_s1 + $0x58] sm:$0xff]  ;;  %s970_s7 = scalar_lea.vmem %s989_s4, %s636_s30 }
  0x10   : > { %v647_v8 = vld [vmem:[%s900_s13 + $0x8] sm:$0xf]  ;;  %v739_v9 = vld [vmem:[%s900_s13 + $0x10] sm:$0xf0]  ;;  %v659_v17 = vld [vmem:[%s900_s13 + $0x20] sm:$0xf] }
  0x11   : > { %435 = vmatpush.bf16.msra.mxu0 %v749_v2  ;;  %762 = vmatpush.bf16.msra.mxu3 %v749_v2  ;;  %v648_v10 = vor.u32 %v739_v9, %v647_v8  ;;  %v745_v15 = vld [vmem:[%s986_s1 + $0x10] sm:$0xff]  ;;  %v742_v18 = vld [vmem:[%s900_s13 + $0x28] sm:$0xf0]  ;;  %v743_v22 = vld [vmem:[%s986_s1] sm:$0xff] }
  0x12   : > { %454 = vmatpush.bf16.msra.mxu1 %v757_v4  ;;  %479 = vmatpush.bf16.msra.mxu2 %v759_v5  ;;  %v753_v16 = vld [vmem:[%s986_s1 + $0x50] sm:$0xff]  ;;  %v744_v19 = vld [vmem:[%s986_s1 + $0x8] sm:$0xff]  ;;  %v660_v21 = vor.u32 %v742_v18, %v659_v17  ;;  %v639_v23 = vld [vmem:[%s900_s13] sm:$0xf] }
  0x13   : > { %v752_v20 = vld [vmem:[%s986_s1 + $0x48] sm:$0xff]  ;;  %v651_v25 = vld [vmem:[%s900_s13 + $0x18] sm:$0xf]  ;;  %v741_v26 = vld [vmem:[%s900_s13 + $0x20] sm:$0xf0] }
  0x14   : > { %v738_v24 = vld [vmem:[%s900_s13 + $0x8] sm:$0xf0]  ;;  %v751_v27 = vld [vmem:[%s986_s1 + $0x40] sm:$0xff]  ;;  %v641_v29 = vld [vmem:[%s900_s13 + $0xc] sm:$0xf0]  ;;  %v652_v31 = vor.u32 %v741_v26, %v651_v25 }
  0x15   : > { %436 = vmatpush.bf16.msra.mxu0 %v748_v6  ;;  %763 = vmatpush.bf16.msra.mxu3 %v748_v6  ;;  %v737_v28 = vld [vmem:[%s900_s13 + $0x4] sm:$0xf]  ;;  %v640_v30 = vor.u32 %v738_v24, %v639_v23  ;;  %v740_v33 = vld [vmem:[%s900_s13 + $0x1c] sm:$0xf]  ;;  %v653_v34 = vld [vmem:[%s900_s13 + $0x24] sm:$0xf0] }
  0x16   : > { %455 = vmatpush.bf16.msra.mxu1 %v756_v7  ;;  %733 = vmatmul.msk.bf16.vlgmr.msra.gmra.mxu2 %vm427_vm0, %v648_v10  ;;  %v644_v32 = vor.u32 %v737_v28, %v641_v29  ;;  %v656_v35 = vor.u32 %v740_v33, %v653_v34  ;;  %v794_v37 = vld [vmem:[%s987_s2] ss:$0 sm:$0xff]  ;;  %v795_v42 = vld [vmem:[%s987_s2 + $0x1] ss:$0 sm:$0xff]  ;;  %v796_v44 = vld [vmem:[%s987_s2 + $0x2] ss:$0 sm:$0xff] }
  0x17   : > { %v797_v51 = vld [vmem:[%s233_s20] ss:$0 sm:$0xff]  ;;  %v798_v55 = vld [vmem:[%s987_s2 + $0x3] ss:$0 sm:$0xff]  ;;  %v799_v59 = vld [vmem:[%s987_s2 + $0x4] ss:$0 sm:$0xff] }
  0x19   : > { %437 = vmatpush.bf16.msra.mxu0 %v747_v11  ;;  %764 = vmatpush.bf16.msra.mxu3 %v747_v11 }
  0x1a   : > { %456 = vmatpush.bf16.msra.mxu1 %v755_v12 }
  0x1d   : > { %438 = vmatpush.bf16.msra.mxu0 %v746_v13  ;;  %765 = vmatpush.bf16.msra.mxu3 %v746_v13 }
  0x1e   : > { %457 = vmatpush.bf16.msra.mxu1 %v754_v14 }
  0x21   : > { %439 = vmatpush.bf16.msra.mxu0 %v745_v15  ;;  %766 = vmatpush.bf16.msra.mxu3 %v745_v15 }
  0x22   : > { %458 = vmatpush.bf16.msra.mxu1 %v753_v16 }
  0x25   : > { %440 = vmatpush.bf16.msra.mxu0 %v744_v19  ;;  %767 = vmatpush.bf16.msra.mxu3 %v744_v19 }
  0x26   : > { %459 = vmatpush.bf16.msra.mxu1 %v752_v20  ;;  %734 = vmatmul.msk.bf16.gmra.mxu2 %vm427_vm0, %v660_v21 }
  0x29   : > { %441 = vmatpush.bf16.msra.mxu0 %v743_v22  ;;  %768 = vmatpush.bf16.msra.mxu3 %v743_v22 }
  0x2a   : > { %460 = vmatpush.bf16.msra.mxu1 %v751_v27 }
  0x2c   : > { %442 = vmatmul.bf16.vlgmr.msra.gmra.mxu0 %v640_v30  ;;  %447 = vmatmul.bf16.vlgmr.msra.gmra.mxu3 %v652_v31 }
  0x2d   : > { %461 = vmatmul.bf16.vlgmr.msra.gmra.mxu1 %v644_v32 }
  0x3d   : > { %466 = vmatmul.bf16.gmra.mxu1 %v656_v35 }
  0x99   : > { %v481_v36 = vpop.f32.mrf.mxu2 }
  0xa1   : > { %v483_v46 = vpop.f32.mrf.mxu2 }
  0xa9   : > { %v443_v38 = vpop.f32.mrf.mxu0  ;;  %v486_v0 = vpop.f32.mrf.mxu2 }
  0xaa   : > { %v444_v39 = vadd.f32 %v794_v37, %v443_v38  ;;  %v462_v40 = vpop.f32.mrf.mxu1 }
  0xac   : > { %v463_v41 = vadd.f32 %v462_v40, %v444_v39 }
  0xae   : > { %v482_v43 = vadd.f32 %v481_v36, %v463_v41 }
  0xaf   : > { %v448_v53 = vpop.f32.mrf.mxu3 }
  0xb0   : > { %v493_v45 = vmul.f32 %v795_v42, %v482_v43  ;;  %v449_v60 = vadd.f32 %v794_v37, %v448_v53 }
  0xb1   : > { %v445_v47 = vpop.f32.mrf.mxu0  ;;  %v488_v19 = vpop.f32.mrf.mxu2 }
  0xb2   : > { %v499_v48 = vadd.f32 %v796_v44, %v493_v45  ;;  %v446_v49 = vadd.f32 %v794_v37, %v445_v47  ;;  %v464_v50 = vpop.f32.mrf.mxu1 }
  0xb4   : > { %vm503_vm1 = vcmp.ge.f32.partialorder %v499_v48, 0.0  ;;  %v507_v52 = vmul.f32 0.01, %v499_v48  ;;  %v465_v54 = vadd.f32 %v464_v50, %v446_v49 }
  0xb6   : > { %v511_v56 = vsel %vm503_vm1, %v499_v48, %v507_v52  ;;  %v484_v57 = vadd.f32 %v483_v46, %v465_v54 }
  0xb7   : > { %v519_v58 = vmul.f32 %v797_v51, %v511_v56  ;;  %v450_v8 = vpop.f32.mrf.mxu3 }
  0xb8   : > { %v494_v61 = vmul.f32 %v795_v42, %v484_v57  ;;  %v451_v13 = vadd.f32 %v794_v37, %v450_v8 }
  0xb9   : > { %v525_v62 = vmul.f32 %v798_v55, %v519_v58 }
  0xba   : > { %v500_v63 = vadd.f32 %v796_v44, %v494_v61  ;;  %v467_v1 = vpop.f32.mrf.mxu1 }
  0xbb   : > { %v531_v2 = vadd.f32 %v799_v59, %v525_v62  ;;  %v468_v3 = vadd.f32 %v467_v1, %v449_v60 }
  0xbc   : > { %vm504_vm2 = vcmp.ge.f32.partialorder %v500_v63, 0.0  ;;  %v508_v4 = vmul.f32 0.01, %v500_v63 }
  0xbd   : > { %vm535_vm3 = vcmp.ge.f32.partialorder %v531_v2, 0.0  ;;  %v539_v5 = vmul.f32 0.01, %v531_v2  ;;  %v487_v6 = vadd.f32 %v486_v0, %v468_v3 }
  0xbe   : > { %v512_v7 = vsel %vm504_vm2, %v500_v63, %v508_v4 }
  0xbf   : > { %v543_v9 = vsel %vm535_vm3, %v531_v2, %v539_v5  ;;  %v520_v10 = vmul.f32 %v797_v51, %v512_v7  ;;  %v495_v11 = vmul.f32 %v795_v42, %v487_v6 }
  0xc0   : > { %547 = vst [vmem:[%s970_s7] sm:$0xff] %v543_v9 }
  0xc1   : > { %v526_v12 = vmul.f32 %v798_v55, %v520_v10  ;;  %v501_v14 = vadd.f32 %v796_v44, %v495_v11 }
  0xc2   : > { %v469_v15 = vpop.f32.mrf.mxu1 }
  0xc3   : > { %v532_v16 = vadd.f32 %v799_v59, %v526_v12  ;;  %vm505_vm4 = vcmp.ge.f32.partialorder %v501_v14, 0.0  ;;  %v509_v17 = vmul.f32 0.01, %v501_v14  ;;  %v470_v18 = vadd.f32 %v469_v15, %v451_v13 }
  0xc5   : > { %vm536_vm5 = vcmp.ge.f32.partialorder %v532_v16, 0.0  ;;  %v540_v20 = vmul.f32 0.01, %v532_v16  ;;  %v513_v21 = vsel %vm505_vm4, %v501_v14, %v509_v17  ;;  %v489_v22 = vadd.f32 %v488_v19, %v470_v18 }
  0xc6   : > { %v521_v23 = vmul.f32 %v797_v51, %v513_v21 }
  0xc7   : > { %v544_v24 = vsel %vm536_vm5, %v532_v16, %v540_v20  ;;  %v496_v25 = vmul.f32 %v795_v42, %v489_v22 }
  0xc8   : > { %548 = vst [vmem:[%s970_s7 + $0x8] sm:$0xff] %v544_v24  ;;  %v527_v26 = vmul.f32 %v798_v55, %v521_v23 }
  0xc9   : > { %v502_v27 = vadd.f32 %v796_v44, %v496_v25 }
  0xca   : > { %v533_v28 = vadd.f32 %v799_v59, %v527_v26 }
  0xcb   : > { %vm506_vm6 = vcmp.ge.f32.partialorder %v502_v27, 0.0  ;;  %v510_v29 = vmul.f32 0.01, %v502_v27 }
  0xcc   : > { %vm537_vm7 = vcmp.ge.f32.partialorder %v533_v28, 0.0  ;;  %v541_v30 = vmul.f32 0.01, %v533_v28 }
  0xcd   : > { %v514_v31 = vsel %vm506_vm6, %v502_v27, %v510_v29 }
  0xce   : > { %v545_v32 = vsel %vm537_vm7, %v533_v28, %v541_v30  ;;  %v522_v33 = vmul.f32 %v797_v51, %v514_v31 }
  0xcf   : > { %549 = vst [vmem:[%s970_s7 + $0x10] sm:$0xff] %v545_v32 }
  0xd0   : > { %v528_v34 = vmul.f32 %v798_v55, %v522_v33 }
  0xd2   : > { %v534_v35 = vadd.f32 %v799_v59, %v528_v34 }
  0xd4   : > { %vm538_vm8 = vcmp.ge.f32.partialorder %v534_v35, 0.0  ;;  %v542_v36 = vmul.f32 0.01, %v534_v35 }
  0xd6   : > { %v546_v37 = vsel %vm538_vm8, %v534_v35, %v542_v36 }
  0xd7   : > { %550 = vst [vmem:[%s970_s7 + $0x18] sm:$0xff] %v546_v37 }
  0xd8 PF: > { %s14_s17 = sadd.s32 1, %s822_s17   ;;  %s990_s15 = smov %s818_s16 }
  0xd9   : > { %p11_p6 = scmp.ge.s32.totalorder %s14_s17, 4   ;;  %s991_s16 = smov %s993_s18 }
  0xdb   :  { %13 = sbr.rel (!%p11_p6) target bundleno = 2 (0x2), region = 69 }

</bundles_post_ra>
